<compile_context>
chip_gen: v6e
topology: v6e:2x2x1
jax: 0.10.0
libtpu: 0.0.40
codegen_flags: <defaults>
</compile_context>

<pallas_src>
import jax
import jax.numpy as jnp
from jax import lax
from jax.experimental import pallas as pl
from jax.experimental.pallas import tpu as pltpu

LANE = 128
SUBLANE = 8


def _round_up(n, m):
    return ((n + m - 1) // m) * m


def _num_tensorcores_per_chip():
    """Best-effort TensorCores per chip: 2 on megacore chips (v4/v5p/v7x), else 1."""
    try:
        info = pltpu.get_tpu_info()
        for name in ("num_cores", "num_tensorcores", "cores_per_chip",
                     "tensorcores_per_chip"):
            v = getattr(info, name, None)
            if isinstance(v, int) and v in (1, 2):
                return v
    except Exception:
        pass
    try:
        kind = jax.devices()[0].device_kind.lower()
        if ("v7" in kind) or ("v4" in kind) or ("v5p" in kind):
            return 2
    except Exception:
        pass
    return 1


# -----------------------------------------------------------------------------
# Pallas kernel: one grid step == `group` images.
#   patches_ref : (group, HW, CKK)      bf16  im2col patches (unpadded lanes)
#   wconv_ref   : (CKK, Fp)             bf16  conv weight as matmul, lane-padded
#   bconv_ref   : (1, Fp)               f32   conv bias (zero in padded lanes)
#   wlin_ref    : (Fp, Ep)              bf16  linear weight with 1/HW folded in
#   blin_ref    : (1, Ep)               f32   linear bias, padded
#   out_ref     : (1, group_pad, Ep)    f32   embeddings (sublane/lane dense)
#   pooled_ref  : (group_pad, Fp)       f32   per-image pooled sums (scratch)
# -----------------------------------------------------------------------------
def _embed_kernel(patches_ref, wconv_ref, bconv_ref, wlin_ref, blin_ref,
                  out_ref, pooled_ref):
    group = patches_ref.shape[0]

    # Zero the pooled accumulator (incl. the sublane-padding rows, so the final
    # store below is a full unmasked (8, 128)-tiled block).
    pooled_ref[...] = jnp.zeros_like(pooled_ref)

    def body(i, carry):
        # One image per iteration: conv-as-matmul on the MXU (bf16 operands,
        # f32 accumulation), bias + ReLU on the VPU, then a row-sum.  Chunking
        # keeps the (HW, Fp) f32 activation transient instead of materializing
        # a (group*HW, Fp) slab in VMEM and re-reading it for the reduction.
        p = patches_ref[i]                                     # (HW, CKK) bf16
        conv = jnp.dot(p, wconv_ref[...], preferred_element_type=jnp.float32)
        act = jnp.maximum(conv + bconv_ref[...], 0.0)          # (HW, Fp) f32
        pooled_ref[pl.ds(i, 1), :] = jnp.sum(act, axis=0, keepdims=True)
        return carry

    lax.fori_loop(0, group, body, 0, unroll=True)

    # Batched final linear; the global-average-pool 1/HW is folded into wlin,
    # so the pooled sums feed the MXU directly.  bf16 operands, f32 acc.
    pooled = pooled_ref[...].astype(jnp.bfloat16)              # (group_pad, Fp)
    emb = jnp.dot(pooled, wlin_ref[...], preferred_element_type=jnp.float32)
    out_ref[0] = (emb + blin_ref[...]).astype(out_ref.dtype)   # full-block store


def _im2col(x_nhwc, k=3):
    """3x3 'same'-padded patches. (G,H,W,C) -> (G, H*W, k*k*C), tap-major."""
    G, H, W, C = x_nhwc.shape
    pad = k // 2
    xp = jnp.pad(x_nhwc, ((0, 0), (pad, pad), (pad, pad), (0, 0)))
    taps = []
    for dh in range(k):
        for dw in range(k):
            taps.append(xp[:, dh:dh + H, dw:dw + W, :])        # (G,H,W,C)
    pat = jnp.stack(taps, axis=3)                              # (G,H,W,k*k,C)
    return pat.reshape(G, H * W, k * k * C)


def embed_pallas(x_nchw, params, num_cores=None):
    """Run the synthetic embedding net on a fused batch of NCHW images."""
    wconv, bconv, wlin, blin = params
    G, C, H, W = x_nchw.shape
    k = 3
    HW = H * W
    CKK = C * k * k
    F = wconv.shape[1]
    E = wlin.shape[1]
    Fp = _round_up(F, LANE)
    Ep = _round_up(E, LANE)

    if num_cores is None:
        num_cores = _num_tensorcores_per_chip()
    # Per-generation grid: a single step on 1-TensorCore chips (v5e/v6e) to
    # avoid per-step pipeline overhead; 2 "parallel" steps on megacore chips
    # (v4/v5p/v7x) so both cores get work.  Pad the fused batch so it always
    # splits evenly (extra zero images are sliced off below).
    nsteps = 2 if (num_cores >= 2 and G >= 2) else 1
    Gp = _round_up(G, nsteps)
    group = Gp // nsteps
    group_pad = _round_up(group, SUBLANE)      # sublane-dense output rows

    # --- plain-JAX glue: layout + im2col (NO lane padding of patches) -------
    # TODO(synk): at realistic H/W, do the 3x3 shift expansion in-kernel (9
    # shifted matmuls on a once-DMA'd padded NHWC tile) instead of HBM im2col
    # to cut input DMA ~9x; with C=4 at 16x16 the lane layout of that variant
    # is vreg-hostile, so the im2col stays in the wrapper at these shapes.
    x_nhwc = jnp.transpose(x_nchw, (0, 2, 3, 1))               # NCHW -> NHWC
    if Gp > G:
        x_nhwc = jnp.pad(x_nhwc, ((0, Gp - G), (0, 0), (0, 0), (0, 0)))
    patches = _im2col(x_nhwc, k=k).astype(jnp.bfloat16)        # (Gp, HW, CKK)

    wconv_p = jnp.pad(wconv, ((0, 0), (0, Fp - F))).astype(jnp.bfloat16)
    bconv_p = jnp.pad(bconv, ((0, 0), (0, Fp - F)))
    # Fold the global-average-pool 1/HW into the linear weight; bf16 MXU operand.
    wlin_p = jnp.pad(wlin * (1.0 / HW),
                     ((0, Fp - F), (0, Ep - E))).astype(jnp.bfloat16)
    blin_p = jnp.pad(blin, ((0, 0), (0, Ep - E)))

    # TODO(synk): for realistic H/W (e.g. 224x224), add an "arbitrary" HW grid
    # axis with the pooled accumulator init/finalized via pl.when and set
    # vmem_limit_bytes explicitly so the per-step patch block fits v7x's
    # 64 MiB VMEM; unnecessary at these test shapes (<0.5 MiB per step).
    out = pl.pallas_call(
        _embed_kernel,
        out_shape=jax.ShapeDtypeStruct((nsteps, group_pad, Ep), jnp.float32),
        grid_spec=pltpu.PrefetchScalarGridSpec(
            num_scalar_prefetch=0,
            grid=(nsteps,),
            in_specs=[
                # `group` images per step; the last dim equals the full array
                # dim (CKK=36), so no HBM lane padding is needed — Mosaic pads
                # lanes in VMEM/vregs for free.
                pl.BlockSpec((group, HW, CKK), lambda s: (s, 0, 0)),
                # Constant-index weight blocks: fetched once, revisited.
                pl.BlockSpec((CKK, Fp), lambda s: (0, 0)),
                pl.BlockSpec((1, Fp), lambda s: (0, 0)),
                pl.BlockSpec((Fp, Ep), lambda s: (0, 0)),
                pl.BlockSpec((1, Ep), lambda s: (0, 0)),
            ],
            out_specs=pl.BlockSpec((1, group_pad, Ep), lambda s: (s, 0, 0)),
            scratch_shapes=[pltpu.VMEM((group_pad, Fp), jnp.float32)],
        ),
        compiler_params=pltpu.CompilerParams(
            dimension_semantics=("parallel",),
        ),
    )(patches, wconv_p, bconv_p, wlin_p, blin_p)

    # Lane-dense (Ep=128) / sublane-dense (group_pad) output slab; slice the
    # real rows and embedding columns here.
    emb = out[:, :group, :].reshape(Gp, Ep)[:G, :E]
    return emb


def triplet_net_forward(x1, x2, x3, params):
    """TripletNet.forward: shared embedding net on x1, x2, x3 (one fused call)."""
    B = x1.shape[0]
    x = jnp.concatenate([x1, x2, x3], axis=0)                  # (3B, C, H, W)
    emb = embed_pallas(x, params)                              # (3B, E)
    return emb[:B], emb[B:2 * B], emb[2 * B:]


def make_params(C=4, F=32, E=16, k=3, seed=42):
    """Deterministic synthetic weights for the embedding net."""
    key = jax.random.PRNGKey(seed)
    k1, k2 = jax.random.split(key)
    # Conv weight stored directly in matmul form (k*k*C, F), matching the
    # (tap-major, channel-minor) patch ordering produced by _im2col.
    wconv = (jax.random.normal(k1, (k * k * C, F), jnp.float32)
             * (1.0 / jnp.sqrt(k * k * C)))
    bconv = jnp.linspace(-0.1, 0.1, F, dtype=jnp.float32).reshape(1, F)
    wlin = (jax.random.normal(k2, (F, E), jnp.float32)
            * (1.0 / jnp.sqrt(F)))
    blin = jnp.linspace(-0.05, 0.05, E, dtype=jnp.float32).reshape(1, E)
    return wconv, bconv, wlin, blin


def embed_reference(x_nchw, params):
    """Pure-JAX reference (same bf16 MXU-operand casting as the kernel)."""
    wconv, bconv, wlin, blin = params
    H, W = x_nchw.shape[2], x_nchw.shape[3]
    HW = H * W
    x_nhwc = jnp.transpose(x_nchw, (0, 2, 3, 1))
    patches = _im2col(x_nhwc, k=3)                             # (G, HW, CKK)
    conv = jnp.einsum(
        "gpk,kf->gpf",
        patches.astype(jnp.bfloat16), wconv.astype(jnp.bfloat16),
        preferred_element_type=jnp.float32)
    act = jnp.maximum(conv + bconv[None], 0.0)
    pooled_sum = jnp.sum(act, axis=1)                          # (G, F)
    emb = jnp.dot(pooled_sum.astype(jnp.bfloat16),
                  (wlin * (1.0 / HW)).astype(jnp.bfloat16),
                  preferred_element_type=jnp.float32) + blin
    return emb


if __name__ == "__main__":
    B, C, H, W = 2, 4, 16, 16
    params = make_params(C=C, F=32, E=16)

    key = jax.random.PRNGKey(0)
    kx1, kx2, kx3 = jax.random.split(key, 3)
    x1 = jax.random.normal(kx1, (B, C, H, W), jnp.float32)
    x2 = jax.random.normal(kx2, (B, C, H, W), jnp.float32)
    x3 = jax.random.normal(kx3, (B, C, H, W), jnp.float32)

    e1, e2, e3 = triplet_net_forward(x1, x2, x3, params)
    jax.block_until_ready((e1, e2, e3))

    assert e1.shape == (B, 16) and e2.shape == (B, 16) and e3.shape == (B, 16)

    # Numerical check against the pure-JAX reference.
    ref = embed_reference(jnp.concatenate([x1, x2, x3], axis=0), params)
    r1, r2, r3 = ref[:B], ref[B:2 * B], ref[2 * B:]
    assert bool(jnp.allclose(e1, r1, atol=2e-2, rtol=2e-2))
    assert bool(jnp.allclose(e2, r2, atol=2e-2, rtol=2e-2))
    assert bool(jnp.allclose(e3, r3, atol=2e-2, rtol=2e-2))

    print("KERNEL_OK")
</pallas_src>

<mosaic_0001>
module attributes {stable_mosaic.version = 11 : i64} {
  func.func @_embed_kernel(%arg0: i32, %arg1: memref<6x256x36xbf16, #tpu.memory_space<vmem>>, %arg2: memref<36x128xbf16, #tpu.memory_space<vmem>>, %arg3: memref<1x128xf32, #tpu.memory_space<vmem>>, %arg4: memref<128x128xbf16, #tpu.memory_space<vmem>>, %arg5: memref<1x128xf32, #tpu.memory_space<vmem>>, %arg6: memref<1x8x128xf32, #tpu.memory_space<vmem>>, %arg7: memref<8x128xf32, #tpu.memory_space<vmem>>) attributes {dimension_semantics = [#tpu.dimension_semantics<parallel>], iteration_bounds = array<i64: 1>, scalar_prefetch = 0 : i64, scratch_operands = 1 : i64, tpu.core_type = #tpu.core_type<tc>, window_params = [{transform_indices = @transform_0, window_bounds = array<i64: 6, 256, 36>}, {pipeline_mode = #tpu.pipeline_mode<synchronous>, transform_indices = @transform_1, window_bounds = array<i64: 36, 128>}, {pipeline_mode = #tpu.pipeline_mode<synchronous>, transform_indices = @transform_2, window_bounds = array<i64: 1, 128>}, {pipeline_mode = #tpu.pipeline_mode<synchronous>, transform_indices = @transform_3, window_bounds = array<i64: 128, 128>}, {pipeline_mode = #tpu.pipeline_mode<synchronous>, transform_indices = @transform_4, window_bounds = array<i64: 1, 128>}, {transform_indices = @transform_5, window_bounds = array<i64: 1, 8, 128>}]} {
    %cst = arith.constant 0.000000e+00 : f32
    %0 = vector.broadcast %cst : f32 to vector<8x128xf32>
    %c0 = arith.constant 0 : index
    %c0_0 = arith.constant 0 : index
    %1 = vector.load %arg7[%c0, %c0_0] : memref<8x128xf32, #tpu.memory_space<vmem>>, vector<8x128xf32>
    tpu.vector_store %arg7[%c0, %c0_0], %0 {strides = array<i32>} : memref<8x128xf32, #tpu.memory_space<vmem>>, vector<8x128xf32>,
    %c0_i32 = arith.constant 0 : i32
    %2 = arith.index_cast %c0_i32 : i32 to index
    %c0_1 = arith.constant 0 : index
    %c0_2 = arith.constant 0 : index
    %3 = vector.load %arg1[%2, %c0_1, %c0_2] : memref<6x256x36xbf16, #tpu.memory_space<vmem>>, vector<1x256x36xbf16>
    %4 = vector.shape_cast %3 : vector<1x256x36xbf16> to vector<256x36xbf16>
    %c0_3 = arith.constant 0 : index
    %c0_4 = arith.constant 0 : index
    %5 = vector.load %arg2[%c0_3, %c0_4] : memref<36x128xbf16, #tpu.memory_space<vmem>>, vector<36x128xbf16>
    %cst_5 = arith.constant dense<0.000000e+00> : vector<256x128xf32>
    %6 = tpu.matmul %4, %5, %cst_5 {dimension_numbers = #tpu.dot_dimension_numbers<[1], [0], [0], [1], [0, 0, 1, 1], [], []>} : vector<256x36xbf16>, vector<36x128xbf16>, vector<256x128xf32> -> vector<256x128xf32>
    %c0_6 = arith.constant 0 : index
    %c0_7 = arith.constant 0 : index
    %7 = vector.load %arg3[%c0_6, %c0_7] : memref<1x128xf32, #tpu.memory_space<vmem>>, vector<1x128xf32>
    %8 = vector.broadcast %7 : vector<1x128xf32> to vector<256x128xf32>
    %9 = arith.addf %6, %8 : vector<256x128xf32>
    %cst_8 = arith.constant 0.000000e+00 : f32
    %10 = vector.broadcast %cst_8 : f32 to vector<256x128xf32>
    %11 = arith.maximumf %9, %10 : vector<256x128xf32>
    %cst_9 = arith.constant dense<0.000000e+00> : vector<128xf32>
    %12 = vector.multi_reduction <add>, %11, %cst_9 [0] : vector<256x128xf32> to vector<128xf32>
    %13 = vector.shape_cast %12 : vector<128xf32> to vector<1x128xf32>
    %14 = arith.index_cast %c0_i32 : i32 to index
    %c0_10 = arith.constant 0 : index
    %15 = vector.load %arg7[%14, %c0_10] : memref<8x128xf32, #tpu.memory_space<vmem>>, vector<1x128xf32>
    tpu.vector_store %arg7[%14, %c0_10], %13 {strides = array<i32>} : memref<8x128xf32, #tpu.memory_space<vmem>>, vector<1x128xf32>,
    %c1_i32 = arith.constant 1 : i32
    %16 = arith.index_cast %c1_i32 : i32 to index
    %c0_11 = arith.constant 0 : index
    %c0_12 = arith.constant 0 : index
    %17 = vector.load %arg1[%16, %c0_11, %c0_12] : memref<6x256x36xbf16, #tpu.memory_space<vmem>>, vector<1x256x36xbf16>
    %18 = vector.shape_cast %17 : vector<1x256x36xbf16> to vector<256x36xbf16>
    %c0_13 = arith.constant 0 : index
    %c0_14 = arith.constant 0 : index
    %19 = vector.load %arg2[%c0_13, %c0_14] : memref<36x128xbf16, #tpu.memory_space<vmem>>, vector<36x128xbf16>
    %cst_15 = arith.constant dense<0.000000e+00> : vector<256x128xf32>
    %20 = tpu.matmul %18, %19, %cst_15 {dimension_numbers = #tpu.dot_dimension_numbers<[1], [0], [0], [1], [0, 0, 1, 1], [], []>} : vector<256x36xbf16>, vector<36x128xbf16>, vector<256x128xf32> -> vector<256x128xf32>
    %c0_16 = arith.constant 0 : index
    %c0_17 = arith.constant 0 : index
    %21 = vector.load %arg3[%c0_16, %c0_17] : memref<1x128xf32, #tpu.memory_space<vmem>>, vector<1x128xf32>
    %22 = vector.broadcast %21 : vector<1x128xf32> to vector<256x128xf32>
    %23 = arith.addf %20, %22 : vector<256x128xf32>
    %cst_18 = arith.constant 0.000000e+00 : f32
    %24 = vector.broadcast %cst_18 : f32 to vector<256x128xf32>
    %25 = arith.maximumf %23, %24 : vector<256x128xf32>
    %cst_19 = arith.constant dense<0.000000e+00> : vector<128xf32>
    %26 = vector.multi_reduction <add>, %25, %cst_19 [0] : vector<256x128xf32> to vector<128xf32>
    %27 = vector.shape_cast %26 : vector<128xf32> to vector<1x128xf32>
    %28 = arith.index_cast %c1_i32 : i32 to index
    %c0_20 = arith.constant 0 : index
    %29 = vector.load %arg7[%28, %c0_20] : memref<8x128xf32, #tpu.memory_space<vmem>>, vector<1x128xf32>
    tpu.vector_store %arg7[%28, %c0_20], %27 {strides = array<i32>} : memref<8x128xf32, #tpu.memory_space<vmem>>, vector<1x128xf32>,
    %c2_i32 = arith.constant 2 : i32
    %30 = arith.index_cast %c2_i32 : i32 to index
    %c0_21 = arith.constant 0 : index
    %c0_22 = arith.constant 0 : index
    %31 = vector.load %arg1[%30, %c0_21, %c0_22] : memref<6x256x36xbf16, #tpu.memory_space<vmem>>, vector<1x256x36xbf16>
    %32 = vector.shape_cast %31 : vector<1x256x36xbf16> to vector<256x36xbf16>
    %c0_23 = arith.constant 0 : index
    %c0_24 = arith.constant 0 : index
    %33 = vector.load %arg2[%c0_23, %c0_24] : memref<36x128xbf16, #tpu.memory_space<vmem>>, vector<36x128xbf16>
    %cst_25 = arith.constant dense<0.000000e+00> : vector<256x128xf32>
    %34 = tpu.matmul %32, %33, %cst_25 {dimension_numbers = #tpu.dot_dimension_numbers<[1], [0], [0], [1], [0, 0, 1, 1], [], []>} : vector<256x36xbf16>, vector<36x128xbf16>, vector<256x128xf32> -> vector<256x128xf32>
    %c0_26 = arith.constant 0 : index
    %c0_27 = arith.constant 0 : index
    %35 = vector.load %arg3[%c0_26, %c0_27] : memref<1x128xf32, #tpu.memory_space<vmem>>, vector<1x128xf32>
    %36 = vector.broadcast %35 : vector<1x128xf32> to vector<256x128xf32>
    %37 = arith.addf %34, %36 : vector<256x128xf32>
    %cst_28 = arith.constant 0.000000e+00 : f32
    %38 = vector.broadcast %cst_28 : f32 to vector<256x128xf32>
    %39 = arith.maximumf %37, %38 : vector<256x128xf32>
    %cst_29 = arith.constant dense<0.000000e+00> : vector<128xf32>
    %40 = vector.multi_reduction <add>, %39, %cst_29 [0] : vector<256x128xf32> to vector<128xf32>
    %41 = vector.shape_cast %40 : vector<128xf32> to vector<1x128xf32>
    %42 = arith.index_cast %c2_i32 : i32 to index
    %c0_30 = arith.constant 0 : index
    %43 = vector.load %arg7[%42, %c0_30] : memref<8x128xf32, #tpu.memory_space<vmem>>, vector<1x128xf32>
    tpu.vector_store %arg7[%42, %c0_30], %41 {strides = array<i32>} : memref<8x128xf32, #tpu.memory_space<vmem>>, vector<1x128xf32>,
    %c3_i32 = arith.constant 3 : i32
    %44 = arith.index_cast %c3_i32 : i32 to index
    %c0_31 = arith.constant 0 : index
    %c0_32 = arith.constant 0 : index
    %45 = vector.load %arg1[%44, %c0_31, %c0_32] : memref<6x256x36xbf16, #tpu.memory_space<vmem>>, vector<1x256x36xbf16>
    %46 = vector.shape_cast %45 : vector<1x256x36xbf16> to vector<256x36xbf16>
    %c0_33 = arith.constant 0 : index
    %c0_34 = arith.constant 0 : index
    %47 = vector.load %arg2[%c0_33, %c0_34] : memref<36x128xbf16, #tpu.memory_space<vmem>>, vector<36x128xbf16>
    %cst_35 = arith.constant dense<0.000000e+00> : vector<256x128xf32>
    %48 = tpu.matmul %46, %47, %cst_35 {dimension_numbers = #tpu.dot_dimension_numbers<[1], [0], [0], [1], [0, 0, 1, 1], [], []>} : vector<256x36xbf16>, vector<36x128xbf16>, vector<256x128xf32> -> vector<256x128xf32>
    %c0_36 = arith.constant 0 : index
    %c0_37 = arith.constant 0 : index
    %49 = vector.load %arg3[%c0_36, %c0_37] : memref<1x128xf32, #tpu.memory_space<vmem>>, vector<1x128xf32>
    %50 = vector.broadcast %49 : vector<1x128xf32> to vector<256x128xf32>
    %51 = arith.addf %48, %50 : vector<256x128xf32>
    %cst_38 = arith.constant 0.000000e+00 : f32
    %52 = vector.broadcast %cst_38 : f32 to vector<256x128xf32>
    %53 = arith.maximumf %51, %52 : vector<256x128xf32>
    %cst_39 = arith.constant dense<0.000000e+00> : vector<128xf32>
    %54 = vector.multi_reduction <add>, %53, %cst_39 [0] : vector<256x128xf32> to vector<128xf32>
    %55 = vector.shape_cast %54 : vector<128xf32> to vector<1x128xf32>
    %56 = arith.index_cast %c3_i32 : i32 to index
    %c0_40 = arith.constant 0 : index
    %57 = vector.load %arg7[%56, %c0_40] : memref<8x128xf32, #tpu.memory_space<vmem>>, vector<1x128xf32>
    tpu.vector_store %arg7[%56, %c0_40], %55 {strides = array<i32>} : memref<8x128xf32, #tpu.memory_space<vmem>>, vector<1x128xf32>,
    %c4_i32 = arith.constant 4 : i32
    %58 = arith.index_cast %c4_i32 : i32 to index
    %c0_41 = arith.constant 0 : index
    %c0_42 = arith.constant 0 : index
    %59 = vector.load %arg1[%58, %c0_41, %c0_42] : memref<6x256x36xbf16, #tpu.memory_space<vmem>>, vector<1x256x36xbf16>
    %60 = vector.shape_cast %59 : vector<1x256x36xbf16> to vector<256x36xbf16>
    %c0_43 = arith.constant 0 : index
    %c0_44 = arith.constant 0 : index
    %61 = vector.load %arg2[%c0_43, %c0_44] : memref<36x128xbf16, #tpu.memory_space<vmem>>, vector<36x128xbf16>
    %cst_45 = arith.constant dense<0.000000e+00> : vector<256x128xf32>
    %62 = tpu.matmul %60, %61, %cst_45 {dimension_numbers = #tpu.dot_dimension_numbers<[1], [0], [0], [1], [0, 0, 1, 1], [], []>} : vector<256x36xbf16>, vector<36x128xbf16>, vector<256x128xf32> -> vector<256x128xf32>
    %c0_46 = arith.constant 0 : index
    %c0_47 = arith.constant 0 : index
    %63 = vector.load %arg3[%c0_46, %c0_47] : memref<1x128xf32, #tpu.memory_space<vmem>>, vector<1x128xf32>
    %64 = vector.broadcast %63 : vector<1x128xf32> to vector<256x128xf32>
    %65 = arith.addf %62, %64 : vector<256x128xf32>
    %cst_48 = arith.constant 0.000000e+00 : f32
    %66 = vector.broadcast %cst_48 : f32 to vector<256x128xf32>
    %67 = arith.maximumf %65, %66 : vector<256x128xf32>
    %cst_49 = arith.constant dense<0.000000e+00> : vector<128xf32>
    %68 = vector.multi_reduction <add>, %67, %cst_49 [0] : vector<256x128xf32> to vector<128xf32>
    %69 = vector.shape_cast %68 : vector<128xf32> to vector<1x128xf32>
    %70 = arith.index_cast %c4_i32 : i32 to index
    %c0_50 = arith.constant 0 : index
    %71 = vector.load %arg7[%70, %c0_50] : memref<8x128xf32, #tpu.memory_space<vmem>>, vector<1x128xf32>
    tpu.vector_store %arg7[%70, %c0_50], %69 {strides = array<i32>} : memref<8x128xf32, #tpu.memory_space<vmem>>, vector<1x128xf32>,
    %c5_i32 = arith.constant 5 : i32
    %72 = arith.index_cast %c5_i32 : i32 to index
    %c0_51 = arith.constant 0 : index
    %c0_52 = arith.constant 0 : index
    %73 = vector.load %arg1[%72, %c0_51, %c0_52] : memref<6x256x36xbf16, #tpu.memory_space<vmem>>, vector<1x256x36xbf16>
    %74 = vector.shape_cast %73 : vector<1x256x36xbf16> to vector<256x36xbf16>
    %c0_53 = arith.constant 0 : index
    %c0_54 = arith.constant 0 : index
    %75 = vector.load %arg2[%c0_53, %c0_54] : memref<36x128xbf16, #tpu.memory_space<vmem>>, vector<36x128xbf16>
    %cst_55 = arith.constant dense<0.000000e+00> : vector<256x128xf32>
    %76 = tpu.matmul %74, %75, %cst_55 {dimension_numbers = #tpu.dot_dimension_numbers<[1], [0], [0], [1], [0, 0, 1, 1], [], []>} : vector<256x36xbf16>, vector<36x128xbf16>, vector<256x128xf32> -> vector<256x128xf32>
    %c0_56 = arith.constant 0 : index
    %c0_57 = arith.constant 0 : index
    %77 = vector.load %arg3[%c0_56, %c0_57] : memref<1x128xf32, #tpu.memory_space<vmem>>, vector<1x128xf32>
    %78 = vector.broadcast %77 : vector<1x128xf32> to vector<256x128xf32>
    %79 = arith.addf %76, %78 : vector<256x128xf32>
    %cst_58 = arith.constant 0.000000e+00 : f32
    %80 = vector.broadcast %cst_58 : f32 to vector<256x128xf32>
    %81 = arith.maximumf %79, %80 : vector<256x128xf32>
    %cst_59 = arith.constant dense<0.000000e+00> : vector<128xf32>
    %82 = vector.multi_reduction <add>, %81, %cst_59 [0] : vector<256x128xf32> to vector<128xf32>
    %83 = vector.shape_cast %82 : vector<128xf32> to vector<1x128xf32>
    %84 = arith.index_cast %c5_i32 : i32 to index
    %c0_60 = arith.constant 0 : index
    %85 = vector.load %arg7[%84, %c0_60] : memref<8x128xf32, #tpu.memory_space<vmem>>, vector<1x128xf32>
    tpu.vector_store %arg7[%84, %c0_60], %83 {strides = array<i32>} : memref<8x128xf32, #tpu.memory_space<vmem>>, vector<1x128xf32>,
    %c6_i32 = arith.constant 6 : i32
    %c0_61 = arith.constant 0 : index
    %c0_62 = arith.constant 0 : index
    %86 = vector.load %arg7[%c0_61, %c0_62] : memref<8x128xf32, #tpu.memory_space<vmem>>, vector<8x128xf32>
    %87 = arith.truncf %86 : vector<8x128xf32> to vector<8x128xbf16>
    %c0_63 = arith.constant 0 : index
    %c0_64 = arith.constant 0 : index
    %88 = vector.load %arg4[%c0_63, %c0_64] : memref<128x128xbf16, #tpu.memory_space<vmem>>, vector<128x128xbf16>
    %cst_65 = arith.constant dense<0.000000e+00> : vector<8x128xf32>
    %89 = tpu.matmul %87, %88, %cst_65 {dimension_numbers = #tpu.dot_dimension_numbers<[1], [0], [0], [1], [0, 0, 1, 1], [], []>} : vector<8x128xbf16>, vector<128x128xbf16>, vector<8x128xf32> -> vector<8x128xf32>
    %c0_66 = arith.constant 0 : index
    %c0_67 = arith.constant 0 : index
    %90 = vector.load %arg5[%c0_66, %c0_67] : memref<1x128xf32, #tpu.memory_space<vmem>>, vector<1x128xf32>
    %91 = vector.broadcast %90 : vector<1x128xf32> to vector<8x128xf32>
    %92 = arith.addf %89, %91 : vector<8x128xf32>
    %c0_68 = arith.constant 0 : index
    %c0_69 = arith.constant 0 : index
    %c0_70 = arith.constant 0 : index
    %93 = vector.load %arg6[%c0_68, %c0_69, %c0_70] : memref<1x8x128xf32, #tpu.memory_space<vmem>>, vector<1x8x128xf32>
    %94 = vector.shape_cast %93 : vector<1x8x128xf32> to vector<8x128xf32>
    %95 = vector.shape_cast %92 : vector<8x128xf32> to vector<1x8x128xf32>
    tpu.vector_store %arg6[%c0_68, %c0_69, %c0_70], %95 {strides = array<i32>} : memref<1x8x128xf32, #tpu.memory_space<vmem>>, vector<1x8x128xf32>,
    return
  }
  func.func @transform_0(%arg0: i32) -> (i32, i32, i32) {
    %c0_i32 = arith.constant 0 : i32
    %c0_i32_0 = arith.constant 0 : i32
    %c0_i32_1 = arith.constant 0 : i32
    return %arg0, %c0_i32, %c0_i32_0 : i32, i32, i32
  }
  func.func @transform_1(%arg0: i32) -> (i32, i32) {
    %c0_i32 = arith.constant 0 : i32
    %c0_i32_0 = arith.constant 0 : i32
    %c0_i32_1 = arith.constant 0 : i32
    return %c0_i32, %c0_i32_0 : i32, i32
  }
  func.func @transform_2(%arg0: i32) -> (i32, i32) {
    %c0_i32 = arith.constant 0 : i32
    %c0_i32_0 = arith.constant 0 : i32
    %c0_i32_1 = arith.constant 0 : i32
    return %c0_i32, %c0_i32_0 : i32, i32
  }
  func.func @transform_3(%arg0: i32) -> (i32, i32) {
    %c0_i32 = arith.constant 0 : i32
    %c0_i32_0 = arith.constant 0 : i32
    %c0_i32_1 = arith.constant 0 : i32
    return %c0_i32, %c0_i32_0 : i32, i32
  }
  func.func @transform_4(%arg0: i32) -> (i32, i32) {
    %c0_i32 = arith.constant 0 : i32
    %c0_i32_0 = arith.constant 0 : i32
    %c0_i32_1 = arith.constant 0 : i32
    return %c0_i32, %c0_i32_0 : i32, i32
  }
  func.func @transform_5(%arg0: i32) -> (i32, i32, i32) {
    %c0_i32 = arith.constant 0 : i32
    %c0_i32_0 = arith.constant 0 : i32
    %c0_i32_1 = arith.constant 0 : i32
    return %arg0, %c0_i32, %c0_i32_0 : i32, i32, i32
  }
}

</mosaic_0001>

<bundles_post_ra>
// kernel: tpu_custom_call.1
= control target key start
LH: loop header
LB: loop body
LE: loop exit
PB: predicated region body
PF: predicated region fallthrough
CT: control target
= control target key end

     0   :  { %vm211_vm0 = vcmask 1041408   ;;  %vm162_vm1 = vcmask 293888   ;;  %s4316_s0 = inlined_call_operand.vmem [shape: bf16[6,256,36], index: 0, kind: input, shape index: {}]   ;;  %s4317_s1 = inlined_call_operand.vmem [shape: bf16[36,128], index: 1, kind: input, shape index: {}]   ;;  %s4318_s2 = inlined_call_operand.vmem [shape: f32[1,128], index: 2, kind: input, shape index: {}]   ;;  %s4319_s3 = inlined_call_operand.vmem [shape: bf16[128,128], index: 3, kind: input, shape index: {}]   ;;  %s4320_s4 = inlined_call_operand.vmem [shape: f32[1,128], index: 4, kind: input, shape index: {}]   ;;  %s4321_s5 = inlined_call_operand.hbm [shape: f32[1,8,128], index: 5, kind: output, shape index: {}]  }
   0x1   :  { %v3449_v0 = vld [vmem:[%s4317_s1 + $0x10] ss:$0 sps:$4 sm:$0x33]   ;;  %v3451_v2 = vld [vmem:[%s4317_s1 + $0x8] sm:$0xff]   ;;  %v3453_v6 = vld [vmem:[%s4317_s1] sm:$0xff]  }
   0x2   :  { %v3450_v1 = vld [vmem:[%s4317_s1 + $0x10] ss:$0 sps:$4 sm:$0x33]   ;;  %3440 = vmatprep.subr.msk.bf16.mxu0 %vm211_vm0, %v3449_v0  ;;  %v213_v3 = vsel %vm211_vm0, %v3449_v0, 0  ;;  %v3452_v4 = vld [vmem:[%s4317_s1 + $0x8] sm:$0xff]   ;;  %v3454_v7 = vld [vmem:[%s4317_s1] sm:$0xff]  }
   0x3   :  { %3441 = vmatprep.subr.msk.bf16.mxu1 %vm211_vm0, %v3450_v1  ;;  %3193 = vmatpush3.bf16.msra.mxu0 %v213_v3  ;;  %v635_v5 = vsel %vm211_vm0, %v3450_v1, 0  ;;  %v3455_v8 = vld [vmem:[%s4316_s0] sm:$0xff]   ;;  %v3457_v10 = vld [vmem:[%s4316_s0 + $0x8] sm:$0xff]   ;;  %v3459_v11 = vld [vmem:[%s4317_s1 + $0x10] ss:$0 sps:$4 sm:$0x33]  }
   0x4   :  { %3231 = vmatpush3.bf16.msra.mxu1 %v635_v5  ;;  %3194 = vmatprep.subr.bf16.mxu0 %v3451_v2  ;;  %v3456_v9 = vld [vmem:[%s4316_s0 + $0x80] sm:$0xff]   ;;  %v3458_v12 = vld [vmem:[%s4316_s0 + $0x88] sm:$0xff]   ;;  %v3460_v13 = vld [vmem:[%s4317_s1 + $0x10] ss:$0 sps:$4 sm:$0x33]   ;;  %v1057_v14 = vsel %vm211_vm0, %v3459_v11, 0 }
   0x5   :  { %3232 = vmatprep.subr.bf16.mxu1 %v3452_v4  ;;  %3198 = vmatprep.mubr.msk.bf16.mxu0 %vm162_vm1, %v3455_v8  ;;  %v3461_v15 = vld [vmem:[%s4316_s0 + $0x10] sm:$0xff]   ;;  %v1479_v16 = vsel %vm211_vm0, %v3460_v13, 0  ;;  %v3463_v18 = vld [vmem:[%s4316_s0 + $0x18] sm:$0xff]   ;;  %v3465_v20 = vld [vmem:[%s4316_s0 + $0x20] sm:$0xff]  }
   0x6   :  { %3236 = vmatprep.mubr.msk.bf16.mxu1 %vm162_vm1, %v3456_v9  ;;  %v3462_v17 = vld [vmem:[%s4316_s0 + $0x90] sm:$0xff]   ;;  %v3464_v19 = vld [vmem:[%s4316_s0 + $0x98] sm:$0xff]   ;;  %v3466_v21 = vld [vmem:[%s4316_s0 + $0xa0] sm:$0xff]  }
   0x7   :  { %3195 = vmatpush3.bf16.msra.mxu0 %v3451_v2  ;;  %v3469_v22 = vld [vmem:[%s4317_s1 + $0x8] sm:$0xff]   ;;  %v3471_v26 = vld [vmem:[%s4316_s0 + $0x30] sm:$0xff]   ;;  %v3473_v28 = vld [vmem:[%s4316_s0 + $0x38] sm:$0xff]  }
   0x8   :  { %3233 = vmatpush3.bf16.msra.mxu1 %v3452_v4  ;;  %3196 = vmatprep.subr.bf16.mxu0 %v3453_v6  ;;  %v3470_v23 = vld [vmem:[%s4317_s1 + $0x8] sm:$0xff]   ;;  %v3472_v27 = vld [vmem:[%s4316_s0 + $0xb0] sm:$0xff]   ;;  %v3474_v29 = vld [vmem:[%s4316_s0 + $0xb8] sm:$0xff]  }
   0x9   :  { %3234 = vmatprep.subr.bf16.mxu1 %v3454_v7  ;;  %v3467_v24 = vld [vmem:[%s4316_s0 + $0x28] sm:$0xff]   ;;  %v3483_v30 = vld [vmem:[%s4317_s1] sm:$0xff]   ;;  %v3479_v36 = vld [vmem:[%s4316_s0 + $0x50] sm:$0xff]  }
   0xa   :  { %v3468_v25 = vld [vmem:[%s4316_s0 + $0xa8] sm:$0xff]   ;;  %v3484_v31 = vld [vmem:[%s4317_s1] sm:$0xff]   ;;  %v3480_v37 = vld [vmem:[%s4316_s0 + $0xd0] sm:$0xff]  }
   0xb   :  { %3197 = vmatpush3.bf16.msra.mxu0 %v3453_v6  ;;  %v3475_v32 = vld [vmem:[%s4316_s0 + $0x40] sm:$0xff]   ;;  %v3477_v34 = vld [vmem:[%s4316_s0 + $0x48] sm:$0xff]   ;;  %v3497_v38 = vld [vmem:[%s4317_s1 + $0x10] ss:$0 sps:$4 sm:$0x33]  }
   0xc   :  { %3235 = vmatpush3.bf16.msra.mxu1 %v3454_v7  ;;  %3442 = vmatprep.subr.msk.bf16.mxu0 %vm211_vm0, %v3459_v11  ;;  %v3476_v33 = vld [vmem:[%s4316_s0 + $0xc0] sm:$0xff]   ;;  %v3478_v35 = vld [vmem:[%s4316_s0 + $0xc8] sm:$0xff]   ;;  %v3481_v39 = vld [vmem:[%s4316_s0 + $0x58] sm:$0xff]   ;;  %v1901_v55 = vsel %vm211_vm0, %v3497_v38, 0 }
   0xd   :  { %3443 = vmatprep.subr.msk.bf16.mxu1 %vm211_vm0, %v3460_v13  ;;  %v3498_v40 = vld [vmem:[%s4317_s1 + $0x10] ss:$0 sps:$4 sm:$0x33]   ;;  %v3482_v41 = vld [vmem:[%s4316_s0 + $0xd8] sm:$0xff]   ;;  %v3485_v42 = vld [vmem:[%s4316_s0 + $0x60] sm:$0xff]  }
   0xe   :  { %3199 = vmatmul.mubr.msk.bf16.vlgmr.msra.gmra.mxu0 %vm162_vm1, %v3457_v10  ;;  %v3486_v43 = vld [vmem:[%s4316_s0 + $0xe0] sm:$0xff]   ;;  %v3487_v44 = vld [vmem:[%s4316_s0 + $0x68] sm:$0xff]   ;;  %v3489_v46 = vld [vmem:[%s4316_s0 + $0x70] sm:$0xff]   ;;  %v2323_v57 = vsel %vm211_vm0, %v3498_v40, 0 }
   0xf   :  { %3237 = vmatmul.mubr.msk.bf16.vlgmr.msra.gmra.mxu1 %vm162_vm1, %v3458_v12  ;;  %3269 = vmatpush3.bf16.msra.mxu0 %v1057_v14  ;;  %v3488_v45 = vld [vmem:[%s4316_s0 + $0xe8] sm:$0xff]   ;;  %v3490_v47 = vld [vmem:[%s4316_s0 + $0xf0] sm:$0xff]   ;;  %v3491_v48 = vld [vmem:[%s4316_s0 + $0x78] sm:$0xff]  }
  0x10   :  { %3307 = vmatpush3.bf16.msra.mxu1 %v1479_v16  ;;  %3202 = vmatprep.mubr.msk.bf16.mxu0 %vm162_vm1, %v3461_v15  ;;  %v3492_v49 = vld [vmem:[%s4316_s0 + $0xf8] sm:$0xff]   ;;  %v3493_v50 = vld [vmem:[%s4316_s0 + $0x100] sm:$0xff]   ;;  %v3495_v52 = vld [vmem:[%s4316_s0 + $0x108] sm:$0xff]  }
  0x11   :  { %3240 = vmatprep.mubr.msk.bf16.mxu1 %vm162_vm1, %v3462_v17  ;;  %3270 = vmatprep.subr.bf16.mxu0 %v3469_v22  ;;  %v3494_v51 = vld [vmem:[%s4316_s0 + $0x180] sm:$0xff]   ;;  %v3496_v53 = vld [vmem:[%s4316_s0 + $0x188] sm:$0xff]   ;;  %v3499_v54 = vld [vmem:[%s4316_s0 + $0x110] sm:$0xff]  }
  0x12   :  { %3308 = vmatprep.subr.bf16.mxu1 %v3470_v23  ;;  %v3500_v56 = vld [vmem:[%s4316_s0 + $0x190] sm:$0xff]   ;;  %v3507_v58 = vld [vmem:[%s4317_s1 + $0x8] sm:$0xff]   ;;  %v3501_v60 = vld [vmem:[%s4316_s0 + $0x118] sm:$0xff]  }
  0x13   :  { %3271 = vmatpush3.bf16.msra.mxu0 %v3469_v22  ;;  %v3508_v59 = vld [vmem:[%s4317_s1 + $0x8] sm:$0xff]   ;;  %v3521_v61 = vld [vmem:[%s4317_s1] sm:$0xff]   ;;  %v3502_v63 = vld [vmem:[%s4316_s0 + $0x198] sm:$0xff]  }
  0x14   :  { %3309 = vmatpush3.bf16.msra.mxu1 %v3470_v23  ;;  %3272 = vmatprep.subr.bf16.mxu0 %v3483_v30  ;;  %v3522_v62 = vld [vmem:[%s4317_s1] sm:$0xff]   ;;  %v3505_v2 = vld [vmem:[%s4316_s0 + $0x128] sm:$0xff]   ;;  %v3509_v4 = vld [vmem:[%s4316_s0 + $0x130] sm:$0xff]  }
  0x15   :  { %3310 = vmatprep.subr.bf16.mxu1 %v3484_v31  ;;  %v3503_v0 = vld [vmem:[%s4316_s0 + $0x120] sm:$0xff]   ;;  %v3506_v3 = vld [vmem:[%s4316_s0 + $0x1a8] sm:$0xff]   ;;  %v3510_v5 = vld [vmem:[%s4316_s0 + $0x1b0] sm:$0xff]  }
  0x16   :  { %3203 = vmatmul.mubr.msk.bf16.gmra.mxu0 %vm162_vm1, %v3463_v18  ;;  %v3504_v1 = vld [vmem:[%s4316_s0 + $0x1a0] sm:$0xff]   ;;  %v3511_v6 = vld [vmem:[%s4316_s0 + $0x138] sm:$0xff]   ;;  %v3515_v10 = vld [vmem:[%s4316_s0 + $0x148] sm:$0xff]  }
  0x17   :  { %3241 = vmatmul.mubr.msk.bf16.gmra.mxu1 %vm162_vm1, %v3464_v19  ;;  %3206 = vmatprep.mubr.msk.bf16.mxu0 %vm162_vm1, %v3465_v20  ;;  %v3512_v7 = vld [vmem:[%s4316_s0 + $0x1b8] sm:$0xff]   ;;  %v3513_v8 = vld [vmem:[%s4316_s0 + $0x140] sm:$0xff]   ;;  %v3516_v11 = vld [vmem:[%s4316_s0 + $0x1c8] sm:$0xff]  }
  0x18   :  { %3244 = vmatprep.mubr.msk.bf16.mxu1 %vm162_vm1, %v3466_v21  ;;  %3273 = vmatpush3.bf16.msra.mxu0 %v3483_v30  ;;  %v3514_v9 = vld [vmem:[%s4316_s0 + $0x1c0] sm:$0xff]   ;;  %v3517_v12 = vld [vmem:[%s4316_s0 + $0x150] sm:$0xff]   ;;  %v3519_v14 = vld [vmem:[%s4316_s0 + $0x158] sm:$0xff]  }
  0x19   :  { %3311 = vmatpush3.bf16.msra.mxu1 %v3484_v31  ;;  %3444 = vmatprep.subr.msk.bf16.mxu0 %vm211_vm0, %v3497_v38  ;;  %v3518_v13 = vld [vmem:[%s4316_s0 + $0x1d0] sm:$0xff]   ;;  %v3520_v15 = vld [vmem:[%s4316_s0 + $0x1d8] sm:$0xff]   ;;  %v3523_v16 = vld [vmem:[%s4316_s0 + $0x160] sm:$0xff]  }
  0x1a   :  { %3445 = vmatprep.subr.msk.bf16.mxu1 %vm211_vm0, %v3498_v40  ;;  %v3524_v17 = vld [vmem:[%s4316_s0 + $0x1e0] sm:$0xff]  }
  0x1e   :  { %3207 = vmatmul.mubr.msk.bf16.gmra.mxu0 %vm162_vm1, %v3467_v24 }
  0x1f   :  { %3245 = vmatmul.mubr.msk.bf16.gmra.mxu1 %vm162_vm1, %v3468_v25  ;;  %3210 = vmatprep.mubr.msk.bf16.mxu0 %vm162_vm1, %v3471_v26 }
  0x20   :  { %3248 = vmatprep.mubr.msk.bf16.mxu1 %vm162_vm1, %v3472_v27 }
  0x26   :  { %3211 = vmatmul.mubr.msk.bf16.gmra.mxu0 %vm162_vm1, %v3473_v28 }
  0x27   :  { %3249 = vmatmul.mubr.msk.bf16.gmra.mxu1 %vm162_vm1, %v3474_v29  ;;  %3214 = vmatprep.mubr.msk.bf16.mxu0 %vm162_vm1, %v3475_v32 }
  0x28   :  { %3252 = vmatprep.mubr.msk.bf16.mxu1 %vm162_vm1, %v3476_v33 }
  0x2e   :  { %3215 = vmatmul.mubr.msk.bf16.gmra.mxu0 %vm162_vm1, %v3477_v34 }
  0x2f   :  { %3253 = vmatmul.mubr.msk.bf16.gmra.mxu1 %vm162_vm1, %v3478_v35  ;;  %3218 = vmatprep.mubr.msk.bf16.mxu0 %vm162_vm1, %v3479_v36 }
  0x30   :  { %3256 = vmatprep.mubr.msk.bf16.mxu1 %vm162_vm1, %v3480_v37 }
  0x36   :  { %3219 = vmatmul.mubr.msk.bf16.gmra.mxu0 %vm162_vm1, %v3481_v39 }
  0x37   :  { %3257 = vmatmul.mubr.msk.bf16.gmra.mxu1 %vm162_vm1, %v3482_v41  ;;  %3222 = vmatprep.mubr.msk.bf16.mxu0 %vm162_vm1, %v3485_v42 }
  0x38   :  { %3260 = vmatprep.mubr.msk.bf16.mxu1 %vm162_vm1, %v3486_v43 }
  0x3e   :  { %3223 = vmatmul.mubr.msk.bf16.gmra.mxu0 %vm162_vm1, %v3487_v44 }
  0x3f   :  { %3261 = vmatmul.mubr.msk.bf16.gmra.mxu1 %vm162_vm1, %v3488_v45  ;;  %3226 = vmatprep.mubr.msk.bf16.mxu0 %vm162_vm1, %v3489_v46 }
  0x40   :  { %3264 = vmatprep.mubr.msk.bf16.mxu1 %vm162_vm1, %v3490_v47 }
  0x46   :  { %3227 = vmatmul.mubr.msk.bf16.gmra.mxu0 %vm162_vm1, %v3491_v48 }
  0x47   :  { %3265 = vmatmul.mubr.msk.bf16.gmra.mxu1 %vm162_vm1, %v3492_v49  ;;  %3274 = vmatprep.mubr.msk.bf16.mxu0 %vm162_vm1, %v3493_v50 }
  0x48   :  { %3312 = vmatprep.mubr.msk.bf16.mxu1 %vm162_vm1, %v3494_v51 }
  0x4e   :  { %3275 = vmatmul.mubr.msk.bf16.vlgmr.msra.gmra.mxu0 %vm162_vm1, %v3495_v52 }
  0x4f   :  { %3313 = vmatmul.mubr.msk.bf16.vlgmr.msra.gmra.mxu1 %vm162_vm1, %v3496_v53  ;;  %3345 = vmatpush3.bf16.msra.mxu0 %v1901_v55 }
  0x50   :  { %3383 = vmatpush3.bf16.msra.mxu1 %v2323_v57  ;;  %3278 = vmatprep.mubr.msk.bf16.mxu0 %vm162_vm1, %v3499_v54 }
  0x51   :  { %3316 = vmatprep.mubr.msk.bf16.mxu1 %vm162_vm1, %v3500_v56  ;;  %3346 = vmatprep.subr.bf16.mxu0 %v3507_v58 }
  0x52   :  { %3384 = vmatprep.subr.bf16.mxu1 %v3508_v59 }
  0x53   :  { %3347 = vmatpush3.bf16.msra.mxu0 %v3507_v58 }
  0x54   :  { %3385 = vmatpush3.bf16.msra.mxu1 %v3508_v59  ;;  %3348 = vmatprep.subr.bf16.mxu0 %v3521_v61 }
  0x55   :  { %3386 = vmatprep.subr.bf16.mxu1 %v3522_v62 }
  0x56   :  { %3279 = vmatmul.mubr.msk.bf16.gmra.mxu0 %vm162_vm1, %v3501_v60 }
  0x57   :  { %3317 = vmatmul.mubr.msk.bf16.gmra.mxu1 %vm162_vm1, %v3502_v63  ;;  %3282 = vmatprep.mubr.msk.bf16.mxu0 %vm162_vm1, %v3503_v0 }
  0x58   :  { %3320 = vmatprep.mubr.msk.bf16.mxu1 %vm162_vm1, %v3504_v1  ;;  %3349 = vmatpush3.bf16.msra.mxu0 %v3521_v61 }
  0x59   :  { %3387 = vmatpush3.bf16.msra.mxu1 %v3522_v62 }
  0x5e   :  { %3283 = vmatmul.mubr.msk.bf16.gmra.mxu0 %vm162_vm1, %v3505_v2 }
  0x5f   :  { %3321 = vmatmul.mubr.msk.bf16.gmra.mxu1 %vm162_vm1, %v3506_v3  ;;  %3286 = vmatprep.mubr.msk.bf16.mxu0 %vm162_vm1, %v3509_v4 }
  0x60   :  { %3324 = vmatprep.mubr.msk.bf16.mxu1 %vm162_vm1, %v3510_v5 }
  0x66   :  { %3287 = vmatmul.mubr.msk.bf16.gmra.mxu0 %vm162_vm1, %v3511_v6 }
  0x67   :  { %3325 = vmatmul.mubr.msk.bf16.gmra.mxu1 %vm162_vm1, %v3512_v7  ;;  %3290 = vmatprep.mubr.msk.bf16.mxu0 %vm162_vm1, %v3513_v8 }
  0x68   :  { %3328 = vmatprep.mubr.msk.bf16.mxu1 %vm162_vm1, %v3514_v9 }
  0x6e   :  { %3291 = vmatmul.mubr.msk.bf16.gmra.mxu0 %vm162_vm1, %v3515_v10 }
  0x6f   :  { %3329 = vmatmul.mubr.msk.bf16.gmra.mxu1 %vm162_vm1, %v3516_v11  ;;  %3294 = vmatprep.mubr.msk.bf16.mxu0 %vm162_vm1, %v3517_v12 }
  0x70   :  { %3332 = vmatprep.mubr.msk.bf16.mxu1 %vm162_vm1, %v3518_v13 }
  0x76   :  { %3295 = vmatmul.mubr.msk.bf16.gmra.mxu0 %vm162_vm1, %v3519_v14 }
  0x77   :  { %10 = vsyncpa [#allocation4], 0  ;;  %3333 = vmatmul.mubr.msk.bf16.gmra.mxu1 %vm162_vm1, %v3520_v15  ;;  %3298 = vmatprep.mubr.msk.bf16.mxu0 %vm162_vm1, %v3523_v16  ;;  %v3525_v18 = vld [vmem:[%s4316_s0 + $0x168] sm:$0xff]   ;;  %v3527_v20 = vld [vmem:[%s4316_s0 + $0x170] sm:$0xff]   ;;  %v3594_v30 = vmov 0.0   ;;  %vm3595_vm2 = vmmov 0  }
  0x78   :  { %3336 = vmatprep.mubr.msk.bf16.mxu1 %vm162_vm1, %v3524_v17  ;;  %v3526_v19 = vld [vmem:[%s4316_s0 + $0x1e8] sm:$0xff]   ;;  %v3528_v21 = vld [vmem:[%s4316_s0 + $0x1f0] sm:$0xff]   ;;  %v3529_v22 = vld [vmem:[%s4316_s0 + $0x178] sm:$0xff]   ;;  %22 = vst [vmem:[#allocation2] sm:$0xff] %v3594_v30  ;;  %3420 = vmatprep.subr.bf16.mxu0 %v3594_v30  ;;  %s3596_s12 = smov [#allocation3]  }
  0x79   :  { %v3530_v23 = vld [vmem:[%s4316_s0 + $0x1f8] sm:$0xff]   ;;  %v3531_v24 = vld [vmem:[%s4316_s0 + $0x200] sm:$0xff]   ;;  %v3533_v26 = vld [vmem:[%s4316_s0 + $0x208] sm:$0xff]   ;;  %s2676_s1 = sshll.u32 %s3596_s12, 4  ;;  %s2677_s1 = int_to_ptr.vmem [resolvable:$true] %s2676_s1 }
  0x7a   :  { %v3532_v25 = vld [vmem:[%s4316_s0 + $0x280] sm:$0xff]   ;;  %v3534_v27 = vld [vmem:[%s4316_s0 + $0x288] sm:$0xff]   ;;  %v3535_v28 = vld [vmem:[%s4316_s0 + $0x210] sm:$0xff]   ;;  %s3572_s13 = scalar_lea.vmem %s2677_s1, 128  ;;  %p3577_p1 = scmp.lt.s32.totalorder %s2677_s1, %s2677_s1 }
  0x7b   :  { %v3536_v29 = vld [vmem:[%s4316_s0 + $0x290] sm:$0xff]   ;;  %v3537_v31 = vld [vmem:[%s4316_s0 + $0x218] sm:$0xff]   ;;  %v3539_v33 = vld [vmem:[%s4316_s0 + $0x220] sm:$0xff]   ;;  %p3573_p0 = scmp.ne.s32.totalorder %s2677_s1, %s3572_s13  ;;  %p3578_p2 = scmp.lt.s32.totalorder %s3572_s13, %s3572_s13 }
  0x7c   :  { %v3538_v32 = vld [vmem:[%s4316_s0 + $0x298] sm:$0xff]   ;;  %v3540_v34 = vld [vmem:[%s4316_s0 + $0x2a0] sm:$0xff]   ;;  %v3541_v35 = vld [vmem:[%s4316_s0 + $0x228] sm:$0xff]  }
  0x7d   :  { %v3542_v36 = vld [vmem:[%s4316_s0 + $0x2a8] sm:$0xff]   ;;  %v3543_v37 = vld [vmem:[%s4316_s0 + $0x230] sm:$0xff]   ;;  %v3545_v39 = vld [vmem:[%s4316_s0 + $0x238] sm:$0xff]   ;;  %p3579_p3 = por %p3578_p2, %p3577_p1 }
  0x7e   :  { %3299 = vmatmul.mubr.msk.bf16.gmra.mxu0 %vm162_vm1, %v3525_v18  ;;  %v3544_v38 = vld [vmem:[%s4316_s0 + $0x2b0] sm:$0xff]   ;;  %v3546_v40 = vld [vmem:[%s4316_s0 + $0x2b8] sm:$0xff]   ;;  %v3547_v41 = vld [vmem:[%s4316_s0 + $0x240] sm:$0xff]  }
  0x7f   :  { %3337 = vmatmul.mubr.msk.bf16.gmra.mxu1 %vm162_vm1, %v3526_v19  ;;  %3302 = vmatprep.mubr.msk.bf16.mxu0 %vm162_vm1, %v3527_v20  ;;  %v3548_v42 = vld [vmem:[%s4316_s0 + $0x2c0] sm:$0xff]   ;;  %v3549_v43 = vld [vmem:[%s4316_s0 + $0x248] sm:$0xff]   ;;  %v3551_v45 = vld [vmem:[%s4316_s0 + $0x250] sm:$0xff]   ;;  %p3580_p4 = pnand %p3579_p3, %p3573_p0 }
  0x80   :  { %3340 = vmatprep.mubr.msk.bf16.mxu1 %vm162_vm1, %v3528_v21  ;;  %v3550_v44 = vld [vmem:[%s4316_s0 + $0x2c8] sm:$0xff]   ;;  %v3552_v46 = vld [vmem:[%s4316_s0 + $0x2d0] sm:$0xff]   ;;  %v3553_v47 = vld [vmem:[%s4316_s0 + $0x258] sm:$0xff]  }
  0x81   :  { %v3554_v48 = vld [vmem:[%s4316_s0 + $0x2d8] sm:$0xff]   ;;  %v3555_v49 = vld [vmem:[%s4316_s0 + $0x260] sm:$0xff]   ;;  %v3557_v51 = vld [vmem:[%s4316_s0 + $0x268] sm:$0xff]  }
  0x82   :  { %v3556_v50 = vld [vmem:[%s4316_s0 + $0x2e0] sm:$0xff]   ;;  %v3558_v52 = vld [vmem:[%s4316_s0 + $0x2e8] sm:$0xff]   ;;  %v3559_v53 = vld [vmem:[%s4316_s0 + $0x270] sm:$0xff]  }
  0x83   :  { %v3560_v54 = vld [vmem:[%s4316_s0 + $0x2f0] sm:$0xff]   ;;  %v3561_v55 = vld [vmem:[%s4316_s0 + $0x278] sm:$0xff]   ;;  %v4082_v61 = vld [vmem:[%s4318_s2] ss:$0 sm:$0xff] }
  0x84   :  { %v3562_v56 = vld [vmem:[%s4316_s0 + $0x2f8] sm:$0xff]  }
  0x86   :  { %3303 = vmatmul.mubr.msk.bf16.gmra.mxu0 %vm162_vm1, %v3529_v22 }
  0x87   :  { %3341 = vmatmul.mubr.msk.bf16.gmra.mxu1 %vm162_vm1, %v3530_v23  ;;  %3350 = vmatprep.mubr.msk.bf16.mxu0 %vm162_vm1, %v3531_v24 }
  0x88   :  { %3388 = vmatprep.mubr.msk.bf16.mxu1 %vm162_vm1, %v3532_v25 }
  0x8e   :  { %3351 = vmatmul.mubr.msk.bf16.vlgmr.msra.gmra.mxu0 %vm162_vm1, %v3533_v26 }
  0x8f   :  { %3389 = vmatmul.mubr.msk.bf16.vlgmr.msra.gmra.mxu1 %vm162_vm1, %v3534_v27  ;;  %3354 = vmatprep.mubr.msk.bf16.mxu0 %vm162_vm1, %v3535_v28 }
  0x90   :  { %3392 = vmatprep.mubr.msk.bf16.mxu1 %vm162_vm1, %v3536_v29 }
  0x96   :  { %3355 = vmatmul.mubr.msk.bf16.gmra.mxu0 %vm162_vm1, %v3537_v31 }
  0x97   :  { %3393 = vmatmul.mubr.msk.bf16.gmra.mxu1 %vm162_vm1, %v3538_v32  ;;  %3358 = vmatprep.mubr.msk.bf16.mxu0 %vm162_vm1, %v3539_v33 }
  0x98   :  { %3396 = vmatprep.mubr.msk.bf16.mxu1 %vm162_vm1, %v3540_v34 }
  0x9e   :  { %3359 = vmatmul.mubr.msk.bf16.gmra.mxu0 %vm162_vm1, %v3541_v35 }
  0x9f   :  { %3397 = vmatmul.mubr.msk.bf16.gmra.mxu1 %vm162_vm1, %v3542_v36  ;;  %3362 = vmatprep.mubr.msk.bf16.mxu0 %vm162_vm1, %v3543_v37 }
  0xa0   :  { %3400 = vmatprep.mubr.msk.bf16.mxu1 %vm162_vm1, %v3544_v38 }
  0xa6   :  { %3363 = vmatmul.mubr.msk.bf16.gmra.mxu0 %vm162_vm1, %v3545_v39 }
  0xa7   :  { %3401 = vmatmul.mubr.msk.bf16.gmra.mxu1 %vm162_vm1, %v3546_v40  ;;  %3366 = vmatprep.mubr.msk.bf16.mxu0 %vm162_vm1, %v3547_v41 }
  0xa8   :  { %3404 = vmatprep.mubr.msk.bf16.mxu1 %vm162_vm1, %v3548_v42 }
  0xae   :  { %3367 = vmatmul.mubr.msk.bf16.gmra.mxu0 %vm162_vm1, %v3549_v43 }
  0xaf   :  { %3405 = vmatmul.mubr.msk.bf16.gmra.mxu1 %vm162_vm1, %v3550_v44  ;;  %3370 = vmatprep.mubr.msk.bf16.mxu0 %vm162_vm1, %v3551_v45 }
  0xb0   :  { %3408 = vmatprep.mubr.msk.bf16.mxu1 %vm162_vm1, %v3552_v46 }
  0xb6   :  { %3371 = vmatmul.mubr.msk.bf16.gmra.mxu0 %vm162_vm1, %v3553_v47 }
  0xb7   :  { %3409 = vmatmul.mubr.msk.bf16.gmra.mxu1 %vm162_vm1, %v3554_v48  ;;  %3374 = vmatprep.mubr.msk.bf16.mxu0 %vm162_vm1, %v3555_v49 }
  0xb8   :  { %3412 = vmatprep.mubr.msk.bf16.mxu1 %vm162_vm1, %v3556_v50 }
  0xbe   :  { %3375 = vmatmul.mubr.msk.bf16.gmra.mxu0 %vm162_vm1, %v3557_v51 }
  0xbf   :  { %3413 = vmatmul.mubr.msk.bf16.gmra.mxu1 %vm162_vm1, %v3558_v52  ;;  %3378 = vmatprep.mubr.msk.bf16.mxu0 %vm162_vm1, %v3559_v53 }
  0xc0   :  { %3416 = vmatprep.mubr.msk.bf16.mxu1 %vm162_vm1, %v3560_v54 }
  0xc6   :  { %3379 = vmatmul.mubr.msk.bf16.gmra.mxu0 %vm162_vm1, %v3561_v55 }
  0xc7   :  { %3417 = vmatmul.mubr.msk.bf16.gmra.mxu1 %vm162_vm1, %v3562_v56  ;;  %3436 = vmatprep.mubr.msk.bf16.mxu0 %vm3595_vm2, %v3594_v30 }
  0xce   :  { %v3200_v57 = vpop.f32.mrf.mxu0 }
  0xcf   :  { %v3238_v58 = vpop.f32.mrf.mxu1  ;;  %v258_v3 = vadd.f32 %v3200_v57, %v4082_v61 }
  0xd0   :  { %v249_v59 = vpop.f32.mrf.mxu0  ;;  %v680_v6 = vadd.f32 %v3238_v58, %v4082_v61 }
  0xd1   :  { %v671_v60 = vpop.f32.mrf.mxu1  ;;  %v250_v63 = vadd.f32 %v4082_v61, %v249_v59  ;;  %v378_v17 = vmax.f32 %v258_v3, 0.0 }
  0xd2   :  { %v3201_v62 = vpop.f32.mrf.mxu0  ;;  %v672_v1 = vadd.f32 %v4082_v61, %v671_v60  ;;  %v800_v21 = vmax.f32 %v680_v6, 0.0 }
  0xd3   :  { %v3239_v0 = vpop.f32.mrf.mxu1  ;;  %v376_v9 = vmax.f32 %v250_v63, 0.0  ;;  %v261_v10 = vadd.f32 %v3201_v62, %v4082_v61 }
  0xd4   :  { %v252_v2 = vpop.f32.mrf.mxu0  ;;  %v798_v13 = vmax.f32 %v672_v1, 0.0  ;;  %v683_v14 = vadd.f32 %v3239_v0, %v4082_v61 }
  0xd5   :  { %v253_v4 = vadd.f32 %v4082_v61, %v252_v2  ;;  %v674_v5 = vpop.f32.mrf.mxu1  ;;  %v379_v25 = vmax.f32 %v261_v10, 0.0 }
  0xd6   :  { %v675_v7 = vadd.f32 %v4082_v61, %v674_v5  ;;  %v3204_v8 = vpop.f32.mrf.mxu0  ;;  %v801_v28 = vmax.f32 %v683_v14, 0.0 }
  0xd7   :  { %v377_v11 = vmax.f32 %v253_v4, 0.0  ;;  %v3242_v12 = vpop.f32.mrf.mxu1  ;;  %v274_v32 = vadd.f32 %v3204_v8, %v4082_v61 }
  0xd8   :  { %v799_v15 = vmax.f32 %v675_v7, 0.0  ;;  %v265_v16 = vpop.f32.mrf.mxu0  ;;  %v696_v37 = vadd.f32 %v3242_v12, %v4082_v61 }
  0xd9   :  { %v408_v18 = vadd.f32 %v377_v11, %v376_v9  ;;  %v266_v19 = vadd.f32 %v4082_v61, %v265_v16  ;;  %v687_v20 = vpop.f32.mrf.mxu1  ;;  %v382_v50 = vmax.f32 %v274_v32, 0.0 }
  0xda   :  { %v830_v22 = vadd.f32 %v799_v15, %v798_v13  ;;  %v688_v23 = vadd.f32 %v4082_v61, %v687_v20  ;;  %v3205_v24 = vpop.f32.mrf.mxu0  ;;  %v804_v54 = vmax.f32 %v696_v37, 0.0 }
  0xdb   :  { %v409_v26 = vadd.f32 %v408_v18, %v378_v17  ;;  %v3243_v27 = vpop.f32.mrf.mxu1  ;;  %v380_v33 = vmax.f32 %v266_v19, 0.0  ;;  %v277_v43 = vadd.f32 %v3205_v24, %v4082_v61 }
  0xdc   :  { %v831_v29 = vadd.f32 %v830_v22, %v800_v21  ;;  %v268_v31 = vpop.f32.mrf.mxu0  ;;  %v802_v38 = vmax.f32 %v688_v23, 0.0  ;;  %v699_v47 = vadd.f32 %v3243_v27, %v4082_v61 }
  0xdd   :  { %v410_v34 = vadd.f32 %v409_v26, %v379_v25  ;;  %v269_v35 = vadd.f32 %v4082_v61, %v268_v31  ;;  %v690_v36 = vpop.f32.mrf.mxu1  ;;  %v383_v58 = vmax.f32 %v277_v43, 0.0 }
  0xde   :  { %v832_v39 = vadd.f32 %v831_v29, %v801_v28  ;;  %v691_v40 = vadd.f32 %v4082_v61, %v690_v36  ;;  %v3208_v41 = vpop.f32.mrf.mxu0  ;;  %v805_v62 = vmax.f32 %v699_v47, 0.0 }
  0xdf   :  { %v411_v42 = vadd.f32 %v410_v34, %v380_v33  ;;  %v381_v44 = vmax.f32 %v269_v35, 0.0  ;;  %v3246_v45 = vpop.f32.mrf.mxu1  ;;  %v290_v1 = vadd.f32 %v3208_v41, %v4082_v61 }
  0xe0   :  { %v833_v46 = vadd.f32 %v832_v39, %v802_v38  ;;  %v803_v48 = vmax.f32 %v691_v40, 0.0  ;;  %v281_v49 = vpop.f32.mrf.mxu0  ;;  %v712_v6 = vadd.f32 %v3246_v45, %v4082_v61 }
  0xe1   :  { %v412_v51 = vadd.f32 %v411_v42, %v381_v44  ;;  %v282_v52 = vadd.f32 %v4082_v61, %v281_v49  ;;  %v703_v53 = vpop.f32.mrf.mxu1  ;;  %v386_v19 = vmax.f32 %v290_v1, 0.0 }
  0xe2   :  { %v834_v55 = vadd.f32 %v833_v46, %v803_v48  ;;  %v704_v56 = vadd.f32 %v4082_v61, %v703_v53  ;;  %v3209_v57 = vpop.f32.mrf.mxu0  ;;  %v808_v23 = vmax.f32 %v712_v6, 0.0 }
  0xe3   :  { %v413_v59 = vadd.f32 %v412_v51, %v382_v50  ;;  %v3247_v60 = vpop.f32.mrf.mxu1  ;;  %v384_v2 = vmax.f32 %v282_v52, 0.0  ;;  %v293_v12 = vadd.f32 %v3209_v57, %v4082_v61 }
  0xe4   :  { %v835_v63 = vadd.f32 %v834_v55, %v804_v54  ;;  %v284_v0 = vpop.f32.mrf.mxu0  ;;  %v806_v7 = vmax.f32 %v704_v56, 0.0  ;;  %v715_v16 = vadd.f32 %v3247_v60, %v4082_v61 }
  0xe5   :  { %v414_v3 = vadd.f32 %v413_v59, %v383_v58  ;;  %v285_v4 = vadd.f32 %v4082_v61, %v284_v0  ;;  %v706_v5 = vpop.f32.mrf.mxu1  ;;  %v387_v27 = vmax.f32 %v293_v12, 0.0 }
  0xe6   :  { %v836_v8 = vadd.f32 %v835_v63, %v805_v62  ;;  %v707_v9 = vadd.f32 %v4082_v61, %v706_v5  ;;  %v3212_v10 = vpop.f32.mrf.mxu0  ;;  %v809_v31 = vmax.f32 %v715_v16, 0.0 }
  0xe7   :  { %v415_v11 = vadd.f32 %v414_v3, %v384_v2  ;;  %v385_v13 = vmax.f32 %v285_v4, 0.0  ;;  %v3250_v14 = vpop.f32.mrf.mxu1  ;;  %v306_v34 = vadd.f32 %v3212_v10, %v4082_v61  ;;  %v3563_v3 = vld [vmem:[%s4319_s3 + $0x38] sm:$0xff]  }
  0xe8   :  { %v837_v15 = vadd.f32 %v836_v8, %v806_v7  ;;  %v807_v17 = vmax.f32 %v707_v9, 0.0  ;;  %v297_v18 = vpop.f32.mrf.mxu0  ;;  %v728_v39 = vadd.f32 %v3250_v14, %v4082_v61  ;;  %3421 = vmatpush3.bf16.msra.mxu0 %v3563_v3 }
  0xe9   :  { %v416_v20 = vadd.f32 %v415_v11, %v385_v13  ;;  %v298_v21 = vadd.f32 %v4082_v61, %v297_v18  ;;  %v719_v22 = vpop.f32.mrf.mxu1  ;;  %v390_v52 = vmax.f32 %v306_v34, 0.0  ;;  %3422 = vmatprep.subr.bf16.mxu0 %v3594_v30 }
  0xea   :  { %v838_v24 = vadd.f32 %v837_v15, %v807_v17  ;;  %v720_v25 = vadd.f32 %v4082_v61, %v719_v22  ;;  %v3213_v26 = vpop.f32.mrf.mxu0  ;;  %v812_v56 = vmax.f32 %v728_v39, 0.0 }
  0xeb   :  { %v417_v28 = vadd.f32 %v416_v20, %v386_v19  ;;  %v3251_v29 = vpop.f32.mrf.mxu1  ;;  %v388_v35 = vmax.f32 %v298_v21, 0.0  ;;  %v309_v45 = vadd.f32 %v3213_v26, %v4082_v61 }
  0xec   :  { %v839_v32 = vadd.f32 %v838_v24, %v808_v23  ;;  %v300_v33 = vpop.f32.mrf.mxu0  ;;  %v810_v40 = vmax.f32 %v720_v25, 0.0  ;;  %v731_v49 = vadd.f32 %v3251_v29, %v4082_v61 }
  0xed   :  { %v418_v36 = vadd.f32 %v417_v28, %v387_v27  ;;  %v301_v37 = vadd.f32 %v4082_v61, %v300_v33  ;;  %v722_v38 = vpop.f32.mrf.mxu1  ;;  %v391_v60 = vmax.f32 %v309_v45, 0.0 }
  0xee   :  { %v840_v41 = vadd.f32 %v839_v32, %v809_v31  ;;  %v723_v42 = vadd.f32 %v4082_v61, %v722_v38  ;;  %v3216_v43 = vpop.f32.mrf.mxu0  ;;  %v813_v0 = vmax.f32 %v731_v49, 0.0 }
  0xef   :  { %v419_v44 = vadd.f32 %v418_v36, %v388_v35  ;;  %v389_v46 = vmax.f32 %v301_v37, 0.0  ;;  %v3254_v47 = vpop.f32.mrf.mxu1  ;;  %v322_v4 = vadd.f32 %v3216_v43, %v4082_v61  ;;  %v3564_v37 = vld [vmem:[%s4319_s3 + $0x30] sm:$0xff]  }
  0xf0   :  { %v841_v48 = vadd.f32 %v840_v41, %v810_v40  ;;  %v811_v50 = vmax.f32 %v723_v42, 0.0  ;;  %v313_v51 = vpop.f32.mrf.mxu0  ;;  %v744_v9 = vadd.f32 %v3254_v47, %v4082_v61  ;;  %3423 = vmatpush3.bf16.msra.mxu0 %v3564_v37 }
  0xf1   :  { %v420_v53 = vadd.f32 %v419_v44, %v389_v46  ;;  %v314_v54 = vadd.f32 %v4082_v61, %v313_v51  ;;  %v735_v55 = vpop.f32.mrf.mxu1  ;;  %v394_v22 = vmax.f32 %v322_v4, 0.0  ;;  %3424 = vmatprep.subr.bf16.mxu0 %v3594_v30 }
  0xf2   :  { %v842_v57 = vadd.f32 %v841_v48, %v811_v50  ;;  %v736_v58 = vadd.f32 %v4082_v61, %v735_v55  ;;  %v3217_v59 = vpop.f32.mrf.mxu0  ;;  %v816_v26 = vmax.f32 %v744_v9, 0.0 }
  0xf3   :  { %v421_v62 = vadd.f32 %v420_v53, %v390_v52  ;;  %v3255_v63 = vpop.f32.mrf.mxu1  ;;  %v392_v5 = vmax.f32 %v314_v54, 0.0  ;;  %v325_v15 = vadd.f32 %v3217_v59, %v4082_v61 }
  0xf4   :  { %v843_v1 = vadd.f32 %v842_v57, %v812_v56  ;;  %v316_v2 = vpop.f32.mrf.mxu0  ;;  %v814_v10 = vmax.f32 %v736_v58, 0.0  ;;  %v747_v19 = vadd.f32 %v3255_v63, %v4082_v61 }
  0xf5   :  { %v422_v6 = vadd.f32 %v421_v62, %v391_v60  ;;  %v317_v7 = vadd.f32 %v4082_v61, %v316_v2  ;;  %v738_v8 = vpop.f32.mrf.mxu1  ;;  %v395_v31 = vmax.f32 %v325_v15, 0.0 }
  0xf6   :  { %v844_v11 = vadd.f32 %v843_v1, %v813_v0  ;;  %v739_v12 = vadd.f32 %v4082_v61, %v738_v8  ;;  %v3220_v13 = vpop.f32.mrf.mxu0  ;;  %v817_v34 = vmax.f32 %v747_v19, 0.0 }
  0xf7   :  { %v423_v14 = vadd.f32 %v422_v6, %v392_v5  ;;  %v393_v16 = vmax.f32 %v317_v7, 0.0  ;;  %v3258_v17 = vpop.f32.mrf.mxu1  ;;  %v338_v38 = vadd.f32 %v3220_v13, %v4082_v61  ;;  %v3565_v7 = vld [vmem:[%s4319_s3 + $0x28] sm:$0xff]  }
  0xf8   :  { %v845_v18 = vadd.f32 %v844_v11, %v814_v10  ;;  %v815_v20 = vmax.f32 %v739_v12, 0.0  ;;  %v329_v21 = vpop.f32.mrf.mxu0  ;;  %v760_v43 = vadd.f32 %v3258_v17, %v4082_v61  ;;  %3425 = vmatpush3.bf16.msra.mxu0 %v3565_v7 }
  0xf9   :  { %v424_v23 = vadd.f32 %v423_v14, %v393_v16  ;;  %v330_v24 = vadd.f32 %v4082_v61, %v329_v21  ;;  %v751_v25 = vpop.f32.mrf.mxu1  ;;  %v398_v56 = vmax.f32 %v338_v38, 0.0  ;;  %3426 = vmatprep.subr.bf16.mxu0 %v3594_v30 }
  0xfa   :  { %v846_v27 = vadd.f32 %v845_v18, %v815_v20  ;;  %v752_v28 = vadd.f32 %v4082_v61, %v751_v25  ;;  %v3221_v29 = vpop.f32.mrf.mxu0  ;;  %v820_v60 = vmax.f32 %v760_v43, 0.0 }
  0xfb   :  { %v425_v32 = vadd.f32 %v424_v23, %v394_v22  ;;  %v3259_v33 = vpop.f32.mrf.mxu1  ;;  %v396_v39 = vmax.f32 %v330_v24, 0.0  ;;  %v341_v49 = vadd.f32 %v3221_v29, %v4082_v61 }
  0xfc   :  { %v847_v35 = vadd.f32 %v846_v27, %v816_v26  ;;  %v332_v36 = vpop.f32.mrf.mxu0  ;;  %v818_v44 = vmax.f32 %v752_v28, 0.0  ;;  %v763_v53 = vadd.f32 %v3259_v33, %v4082_v61 }
  0xfd   :  { %v426_v40 = vadd.f32 %v425_v32, %v395_v31  ;;  %v333_v41 = vadd.f32 %v4082_v61, %v332_v36  ;;  %v754_v42 = vpop.f32.mrf.mxu1  ;;  %v399_v1 = vmax.f32 %v341_v49, 0.0 }
  0xfe   :  { %v848_v45 = vadd.f32 %v847_v35, %v817_v34  ;;  %v755_v46 = vadd.f32 %v4082_v61, %v754_v42  ;;  %v3224_v47 = vpop.f32.mrf.mxu0  ;;  %v821_v4 = vmax.f32 %v763_v53, 0.0 }
  0xff   :  { %v427_v48 = vadd.f32 %v426_v40, %v396_v39  ;;  %v397_v50 = vmax.f32 %v333_v41, 0.0  ;;  %v3262_v51 = vpop.f32.mrf.mxu1  ;;  %v354_v8 = vadd.f32 %v3224_v47, %v4082_v61  ;;  %v3566_v41 = vld [vmem:[%s4319_s3 + $0x20] sm:$0xff]  }
 0x100   :  { %v849_v52 = vadd.f32 %v848_v45, %v818_v44  ;;  %v819_v54 = vmax.f32 %v755_v46, 0.0  ;;  %v345_v55 = vpop.f32.mrf.mxu0  ;;  %v776_v13 = vadd.f32 %v3262_v51, %v4082_v61  ;;  %3427 = vmatpush3.bf16.msra.mxu0 %v3566_v41 }
 0x101   :  { %v428_v57 = vadd.f32 %v427_v48, %v397_v50  ;;  %v346_v58 = vadd.f32 %v4082_v61, %v345_v55  ;;  %v767_v59 = vpop.f32.mrf.mxu1  ;;  %v402_v26 = vmax.f32 %v354_v8, 0.0  ;;  %3428 = vmatprep.subr.bf16.mxu0 %v3594_v30 }
 0x102   :  { %v850_v62 = vadd.f32 %v849_v52, %v819_v54  ;;  %v768_v63 = vadd.f32 %v4082_v61, %v767_v59  ;;  %v3225_v0 = vpop.f32.mrf.mxu0  ;;  %v824_v31 = vmax.f32 %v776_v13, 0.0 }
 0x103   :  { %v429_v2 = vadd.f32 %v428_v57, %v398_v56  ;;  %v3263_v3 = vpop.f32.mrf.mxu1  ;;  %v400_v9 = vmax.f32 %v346_v58, 0.0  ;;  %v357_v19 = vadd.f32 %v3225_v0, %v4082_v61 }
 0x104   :  { %v851_v5 = vadd.f32 %v850_v62, %v820_v60  ;;  %v348_v6 = vpop.f32.mrf.mxu0  ;;  %v822_v14 = vmax.f32 %v768_v63, 0.0  ;;  %v779_v23 = vadd.f32 %v3263_v3, %v4082_v61 }
 0x105   :  { %v430_v10 = vadd.f32 %v429_v2, %v399_v1  ;;  %v349_v11 = vadd.f32 %v4082_v61, %v348_v6  ;;  %v770_v12 = vpop.f32.mrf.mxu1  ;;  %v403_v35 = vmax.f32 %v357_v19, 0.0 }
 0x106   :  { %v852_v15 = vadd.f32 %v851_v5, %v821_v4  ;;  %v771_v16 = vadd.f32 %v4082_v61, %v770_v12  ;;  %v3228_v17 = vpop.f32.mrf.mxu0  ;;  %v825_v38 = vmax.f32 %v779_v23, 0.0 }
 0x107   :  { %v431_v18 = vadd.f32 %v430_v10, %v400_v9  ;;  %v401_v20 = vmax.f32 %v349_v11, 0.0  ;;  %v3266_v21 = vpop.f32.mrf.mxu1  ;;  %v370_v42 = vadd.f32 %v3228_v17, %v4082_v61 }
 0x108   :  { %v853_v22 = vadd.f32 %v852_v15, %v822_v14  ;;  %v823_v24 = vmax.f32 %v771_v16, 0.0  ;;  %v361_v25 = vpop.f32.mrf.mxu0  ;;  %v792_v47 = vadd.f32 %v3266_v21, %v4082_v61 }
 0x109   :  { %v432_v27 = vadd.f32 %v431_v18, %v401_v20  ;;  %v362_v28 = vadd.f32 %v4082_v61, %v361_v25  ;;  %v783_v29 = vpop.f32.mrf.mxu1  ;;  %v406_v60 = vmax.f32 %v370_v42, 0.0 }
 0x10a   :  { %v854_v32 = vadd.f32 %v853_v22, %v823_v24  ;;  %v784_v33 = vadd.f32 %v4082_v61, %v783_v29  ;;  %v3229_v34 = vpop.f32.mrf.mxu0  ;;  %v828_v0 = vmax.f32 %v792_v47, 0.0 }
 0x10b   :  { %v433_v36 = vadd.f32 %v432_v27, %v402_v26  ;;  %v3267_v37 = vpop.f32.mrf.mxu1  ;;  %v404_v43 = vmax.f32 %v362_v28, 0.0  ;;  %v373_v53 = vadd.f32 %v3229_v34, %v4082_v61 }
 0x10c   :  { %v855_v39 = vadd.f32 %v854_v32, %v824_v31  ;;  %v364_v40 = vpop.f32.mrf.mxu0  ;;  %v826_v48 = vmax.f32 %v784_v33, 0.0  ;;  %v795_v57 = vadd.f32 %v3267_v37, %v4082_v61 }
 0x10d   :  { %v434_v44 = vadd.f32 %v433_v36, %v403_v35  ;;  %v365_v45 = vadd.f32 %v4082_v61, %v364_v40  ;;  %v786_v46 = vpop.f32.mrf.mxu1  ;;  %v407_v4 = vmax.f32 %v373_v53, 0.0 }
 0x10e   :  { %v856_v49 = vadd.f32 %v855_v39, %v825_v38  ;;  %v787_v50 = vadd.f32 %v4082_v61, %v786_v46  ;;  %v3276_v51 = vpop.f32.mrf.mxu0  ;;  %v829_v7 = vmax.f32 %v795_v57, 0.0 }
 0x10f   :  { %v435_v52 = vadd.f32 %v434_v44, %v404_v43  ;;  %v405_v54 = vmax.f32 %v365_v45, 0.0  ;;  %v3314_v55 = vpop.f32.mrf.mxu1  ;;  %v1102_v12 = vadd.f32 %v3276_v51, %v4082_v61 }
 0x110   :  { %v857_v56 = vadd.f32 %v856_v49, %v826_v48  ;;  %v827_v58 = vmax.f32 %v787_v50, 0.0  ;;  %v1093_v59 = vpop.f32.mrf.mxu0  ;;  %v1524_v16 = vadd.f32 %v3314_v55, %v4082_v61  ;;  %v3567_v55 = vld [vmem:[%s4319_s3 + $0x18] sm:$0xff]  }
 0x111   :  { %v436_v62 = vadd.f32 %v435_v52, %v405_v54  ;;  %v1515_v63 = vpop.f32.mrf.mxu1  ;;  %v1094_v2 = vadd.f32 %v4082_v61, %v1093_v59  ;;  %v1222_v31 = vmax.f32 %v1102_v12, 0.0  ;;  %3429 = vmatpush3.bf16.msra.mxu0 %v3567_v55 }
 0x112   :  { %v858_v1 = vadd.f32 %v857_v56, %v827_v58  ;;  %v3277_v3 = vpop.f32.mrf.mxu0  ;;  %v1516_v9 = vadd.f32 %v4082_v61, %v1515_v63  ;;  %v1644_v36 = vmax.f32 %v1524_v16, 0.0  ;;  %3430 = vmatprep.subr.bf16.mxu0 %v3594_v30 }
 0x113   :  { %v437_v5 = vadd.f32 %v436_v62, %v406_v60  ;;  %v3315_v6 = vpop.f32.mrf.mxu1  ;;  %v1220_v17 = vmax.f32 %v1094_v2, 0.0  ;;  %v1105_v21 = vadd.f32 %v3277_v3, %v4082_v61 }
 0x114   :  { %v859_v8 = vadd.f32 %v858_v1, %v828_v0  ;;  %v1096_v10 = vpop.f32.mrf.mxu0  ;;  %v1527_v22 = vadd.f32 %v3315_v6, %v4082_v61  ;;  %v1642_v26 = vmax.f32 %v1516_v9, 0.0 }
 0x115   :  { %v438_v11 = vadd.f32 %v437_v5, %v407_v4  ;;  %v1097_v13 = vadd.f32 %v4082_v61, %v1096_v10  ;;  %v1518_v14 = vpop.f32.mrf.mxu1  ;;  %v1223_v41 = vmax.f32 %v1105_v21, 0.0 }
 0x116   :  { %v860_v15 = vadd.f32 %v859_v8, %v829_v7  ;;  %v1519_v18 = vadd.f32 %v4082_v61, %v1518_v14  ;;  %v3280_v19 = vpop.f32.mrf.mxu0  ;;  %v1645_v42 = vmax.f32 %v1527_v22, 0.0 }
 0x117   :  { %v439_v20 = vrot.slane %v438_v11, 4  ;;  %v1221_v23 = vmax.f32 %v1097_v13, 0.0  ;;  %v3318_v24 = vpop.f32.mrf.mxu1  ;;  %v1118_v47 = vadd.f32 %v3280_v19, %v4082_v61  ;;  %v3568_v13 = vld [vmem:[%s4319_s3 + $0x10] sm:$0xff]  }
 0x118   :  { %v861_v25 = vrot.slane %v860_v15, 4  ;;  %v1643_v27 = vmax.f32 %v1519_v18, 0.0  ;;  %v1109_v28 = vpop.f32.mrf.mxu0  ;;  %v1540_v48 = vadd.f32 %v3318_v24, %v4082_v61  ;;  %3431 = vmatpush3.bf16.msra.mxu0 %v3568_v13 }
 0x119   :  { %v440_v29 = vadd.f32 %v439_v20, %v438_v11  ;;  %v1252_v32 = vadd.f32 %v1221_v23, %v1220_v17  ;;  %v1110_v33 = vadd.f32 %v4082_v61, %v1109_v28  ;;  %v1531_v34 = vpop.f32.mrf.mxu1  ;;  %v1226_v9 = vmax.f32 %v1118_v47, 0.0  ;;  %3432 = vmatprep.subr.bf16.mxu0 %v3594_v30 }
 0x11a   :  { %v862_v35 = vadd.f32 %v861_v25, %v860_v15  ;;  %v1674_v37 = vadd.f32 %v1643_v27, %v1642_v26  ;;  %v1532_v38 = vadd.f32 %v4082_v61, %v1531_v34  ;;  %v3281_v39 = vpop.f32.mrf.mxu0  ;;  %v1648_v15 = vmax.f32 %v1540_v48, 0.0  ;;  %v3569_v25 = vld [vmem:[%s4319_s3 + $0x8] sm:$0xff]  }
 0x11b   :  { %v441_v40 = vrot.slane %v440_v29, 2  ;;  %v1253_v43 = vadd.f32 %v1252_v32, %v1222_v31  ;;  %v3319_v44 = vpop.f32.mrf.mxu1  ;;  %v1224_v51 = vmax.f32 %v1110_v33, 0.0  ;;  %v1121_v0 = vadd.f32 %v3281_v39, %v4082_v61 }
 0x11c   :  { %v863_v45 = vrot.slane %v862_v35, 2  ;;  %v1675_v46 = vadd.f32 %v1674_v37, %v1644_v36  ;;  %v1112_v49 = vpop.f32.mrf.mxu0  ;;  %v1646_v57 = vmax.f32 %v1532_v38, 0.0  ;;  %v1543_v5 = vadd.f32 %v3319_v44, %v4082_v61  ;;  %3433 = vmatpush3.bf16.msra.mxu0 %v3569_v25 }
 0x11d   :  { %v442_v50 = vadd.f32 %v441_v40, %v440_v29  ;;  %v1254_v52 = vadd.f32 %v1253_v43, %v1223_v41  ;;  %v1113_v53 = vadd.f32 %v4082_v61, %v1112_v49  ;;  %v1534_v54 = vpop.f32.mrf.mxu1  ;;  %v1227_v19 = vmax.f32 %v1121_v0, 0.0  ;;  %v3570_v41 = vld [vmem:[%s4319_s3] sm:$0xff]   ;;  %3434 = vmatprep.subr.bf16.mxu0 %v3594_v30 }
 0x11e   :  { %v864_v56 = vadd.f32 %v863_v45, %v862_v35  ;;  %v1676_v58 = vadd.f32 %v1675_v46, %v1645_v42  ;;  %v1535_v59 = vadd.f32 %v4082_v61, %v1534_v54  ;;  %v3284_v60 = vpop.f32.mrf.mxu0  ;;  %v1649_v22 = vmax.f32 %v1543_v5, 0.0 }
 0x11f   :  { %v443_v62 = vrot.slane %v442_v50, 1  ;;  %v1255_v63 = vadd.f32 %v1254_v52, %v1224_v51  ;;  %v1225_v1 = vmax.f32 %v1113_v53, 0.0  ;;  %v3322_v2 = vpop.f32.mrf.mxu1  ;;  %v1134_v26 = vadd.f32 %v3284_v60, %v4082_v61 }
 0x120   :  { %v865_v3 = vrot.slane %v864_v56, 1  ;;  %v1677_v4 = vadd.f32 %v1676_v58, %v1646_v57  ;;  %v1647_v6 = vmax.f32 %v1535_v59, 0.0  ;;  %v1125_v7 = vpop.f32.mrf.mxu0  ;;  %v1556_v32 = vadd.f32 %v3322_v2, %v4082_v61  ;;  %3435 = vmatpush3.bf16.msra.mxu0 %v3570_v41 }
 0x121   :  { %v444_v8 = vadd.f32 %v443_v62, %v442_v50  ;;  %v1256_v10 = vadd.f32 %v1255_v63, %v1225_v1  ;;  %v1126_v11 = vadd.f32 %v4082_v61, %v1125_v7  ;;  %v1547_v12 = vpop.f32.mrf.mxu1  ;;  %v1230_v46 = vmax.f32 %v1134_v26, 0.0 }
 0x122   :  { %v866_v14 = vadd.f32 %v865_v3, %v864_v56  ;;  %v1678_v16 = vadd.f32 %v1677_v4, %v1647_v6  ;;  %v1548_v17 = vadd.f32 %v4082_v61, %v1547_v12  ;;  %v3285_v18 = vpop.f32.mrf.mxu0  ;;  %v1652_v50 = vmax.f32 %v1556_v32, 0.0 }
 0x123   :  { %445 = vst [vmem:[#allocation2] sm:$0x1] %v444_v8  ;;  %v1257_v20 = vadd.f32 %v1256_v10, %v1226_v9  ;;  %v3323_v21 = vpop.f32.mrf.mxu1  ;;  %v1228_v27 = vmax.f32 %v1126_v11, 0.0  ;;  %v1137_v38 = vadd.f32 %v3285_v18, %v4082_v61 }
 0x124   :  { %867 = vst [vmem:[#allocation2 + $0x1] sm:$0x1] %v866_v14  ;;  %v1679_v23 = vadd.f32 %v1678_v16, %v1648_v15  ;;  %v1128_v24 = vpop.f32.mrf.mxu0  ;;  %v1650_v33 = vmax.f32 %v1548_v17, 0.0  ;;  %v1559_v43 = vadd.f32 %v3323_v21, %v4082_v61 }
 0x125   :  { %v1258_v28 = vadd.f32 %v1257_v20, %v1227_v19  ;;  %v1129_v29 = vadd.f32 %v4082_v61, %v1128_v24  ;;  %v1550_v31 = vpop.f32.mrf.mxu1  ;;  %v1231_v54 = vmax.f32 %v1137_v38, 0.0 }
 0x126   :  { %v1680_v34 = vadd.f32 %v1679_v23, %v1649_v22  ;;  %v1551_v35 = vadd.f32 %v4082_v61, %v1550_v31  ;;  %v3288_v36 = vpop.f32.mrf.mxu0  ;;  %v1653_v57 = vmax.f32 %v1559_v43, 0.0 }
 0x127   :  { %v1259_v37 = vadd.f32 %v1258_v28, %v1228_v27  ;;  %v1229_v39 = vmax.f32 %v1129_v29, 0.0  ;;  %v3326_v40 = vpop.f32.mrf.mxu1  ;;  %v1150_v60 = vadd.f32 %v3288_v36, %v4082_v61 }
 0x128   :  { %v1681_v42 = vadd.f32 %v1680_v34, %v1650_v33  ;;  %v1651_v44 = vmax.f32 %v1551_v35, 0.0  ;;  %v1141_v45 = vpop.f32.mrf.mxu0  ;;  %v1572_v1 = vadd.f32 %v3326_v40, %v4082_v61 }
 0x129   :  { %v1260_v47 = vadd.f32 %v1259_v37, %v1229_v39  ;;  %v1142_v48 = vadd.f32 %v4082_v61, %v1141_v45  ;;  %v1563_v49 = vpop.f32.mrf.mxu1  ;;  %v1234_v14 = vmax.f32 %v1150_v60, 0.0 }
 0x12a   :  { %v1682_v51 = vadd.f32 %v1681_v42, %v1651_v44  ;;  %v1564_v52 = vadd.f32 %v4082_v61, %v1563_v49  ;;  %v3289_v53 = vpop.f32.mrf.mxu0  ;;  %v1656_v18 = vmax.f32 %v1572_v1, 0.0 }
 0x12b   :  { %v1261_v55 = vadd.f32 %v1260_v47, %v1230_v46  ;;  %v3327_v56 = vpop.f32.mrf.mxu1  ;;  %v1232_v30 = vmax.f32 %v1142_v48, 0.0  ;;  %v1153_v7 = vadd.f32 %v3289_v53, %v4082_v61 }
 0x12c   :  { %v1683_v58 = vadd.f32 %v1682_v51, %v1652_v50  ;;  %v1144_v59 = vpop.f32.mrf.mxu0  ;;  %v1654_v2 = vmax.f32 %v1564_v52, 0.0  ;;  %v1575_v11 = vadd.f32 %v3327_v56, %v4082_v61 }
 0x12d   :  { %v1262_v62 = vadd.f32 %v1261_v55, %v1231_v54  ;;  %v1145_v63 = vadd.f32 %v4082_v61, %v1144_v59  ;;  %v1566_v0 = vpop.f32.mrf.mxu1  ;;  %v1235_v22 = vmax.f32 %v1153_v7, 0.0 }
 0x12e   :  { %v1684_v3 = vadd.f32 %v1683_v58, %v1653_v57  ;;  %v1567_v4 = vadd.f32 %v4082_v61, %v1566_v0  ;;  %v3292_v5 = vpop.f32.mrf.mxu0  ;;  %v1657_v25 = vmax.f32 %v1575_v11, 0.0 }
 0x12f   :  { %v1263_v6 = vadd.f32 %v1262_v62, %v1232_v30  ;;  %v1233_v8 = vmax.f32 %v1145_v63, 0.0  ;;  %v3330_v9 = vpop.f32.mrf.mxu1  ;;  %v1166_v28 = vadd.f32 %v3292_v5, %v4082_v61 }
 0x130   :  { %v1685_v10 = vadd.f32 %v1684_v3, %v1654_v2  ;;  %v1655_v12 = vmax.f32 %v1567_v4, 0.0  ;;  %v1157_v13 = vpop.f32.mrf.mxu0  ;;  %v1588_v34 = vadd.f32 %v3330_v9, %v4082_v61 }
 0x131   :  { %v1264_v15 = vadd.f32 %v1263_v6, %v1233_v8  ;;  %v1158_v16 = vadd.f32 %v4082_v61, %v1157_v13  ;;  %v1579_v17 = vpop.f32.mrf.mxu1  ;;  %v1238_v47 = vmax.f32 %v1166_v28, 0.0 }
 0x132   :  { %v1686_v19 = vadd.f32 %v1685_v10, %v1655_v12  ;;  %v1580_v20 = vadd.f32 %v4082_v61, %v1579_v17  ;;  %v3293_v21 = vpop.f32.mrf.mxu0  ;;  %v1660_v51 = vmax.f32 %v1588_v34, 0.0 }
 0x133   :  { %v1265_v23 = vadd.f32 %v1264_v15, %v1234_v14  ;;  %v3331_v24 = vpop.f32.mrf.mxu1  ;;  %v1236_v29 = vmax.f32 %v1158_v16, 0.0  ;;  %v1169_v40 = vadd.f32 %v3293_v21, %v4082_v61 }
 0x134   :  { %v1687_v26 = vadd.f32 %v1686_v19, %v1656_v18  ;;  %v1160_v27 = vpop.f32.mrf.mxu0  ;;  %v1658_v35 = vmax.f32 %v1580_v20, 0.0  ;;  %v1591_v44 = vadd.f32 %v3331_v24, %v4082_v61 }
 0x135   :  { %v1266_v31 = vadd.f32 %v1265_v23, %v1235_v22  ;;  %v1161_v32 = vadd.f32 %v4082_v61, %v1160_v27  ;;  %v1582_v33 = vpop.f32.mrf.mxu1  ;;  %v1239_v55 = vmax.f32 %v1169_v40, 0.0 }
 0x136   :  { %v1688_v36 = vadd.f32 %v1687_v26, %v1657_v25  ;;  %v1583_v37 = vadd.f32 %v4082_v61, %v1582_v33  ;;  %v3296_v38 = vpop.f32.mrf.mxu0  ;;  %v1661_v58 = vmax.f32 %v1591_v44, 0.0 }
 0x137   :  { %v1267_v39 = vadd.f32 %v1266_v31, %v1236_v29  ;;  %v1237_v41 = vmax.f32 %v1161_v32, 0.0  ;;  %v3334_v42 = vpop.f32.mrf.mxu1  ;;  %v1182_v30 = vadd.f32 %v3296_v38, %v4082_v61 }
 0x138   :  { %v1689_v43 = vadd.f32 %v1688_v36, %v1658_v35  ;;  %v1659_v45 = vmax.f32 %v1583_v37, 0.0  ;;  %v1173_v46 = vpop.f32.mrf.mxu0  ;;  %v1604_v2 = vadd.f32 %v3334_v42, %v4082_v61 }
 0x139   :  { %v1268_v48 = vadd.f32 %v1267_v39, %v1237_v41  ;;  %v1174_v49 = vadd.f32 %v4082_v61, %v1173_v46  ;;  %v1595_v50 = vpop.f32.mrf.mxu1  ;;  %v1242_v15 = vmax.f32 %v1182_v30, 0.0 }
 0x13a   :  { %v1690_v52 = vadd.f32 %v1689_v43, %v1659_v45  ;;  %v1596_v53 = vadd.f32 %v4082_v61, %v1595_v50  ;;  %v3297_v54 = vpop.f32.mrf.mxu0  ;;  %v1664_v19 = vmax.f32 %v1604_v2, 0.0 }
 0x13b   :  { %v1269_v56 = vadd.f32 %v1268_v48, %v1238_v47  ;;  %v3335_v57 = vpop.f32.mrf.mxu1  ;;  %v1240_v62 = vmax.f32 %v1174_v49, 0.0  ;;  %v1185_v8 = vadd.f32 %v3297_v54, %v4082_v61 }
 0x13c   :  { %v1691_v59 = vadd.f32 %v1690_v52, %v1660_v51  ;;  %v1176_v60 = vpop.f32.mrf.mxu0  ;;  %v1662_v3 = vmax.f32 %v1596_v53, 0.0  ;;  %v1607_v12 = vadd.f32 %v3335_v57, %v4082_v61 }
 0x13d   :  { %v1270_v63 = vadd.f32 %v1269_v56, %v1239_v55  ;;  %v1177_v0 = vadd.f32 %v4082_v61, %v1176_v60  ;;  %v1598_v1 = vpop.f32.mrf.mxu1  ;;  %v1243_v23 = vmax.f32 %v1185_v8, 0.0 }
 0x13e   :  { %v1692_v4 = vadd.f32 %v1691_v59, %v1661_v58  ;;  %v1599_v5 = vadd.f32 %v4082_v61, %v1598_v1  ;;  %v3300_v6 = vpop.f32.mrf.mxu0  ;;  %v1665_v26 = vmax.f32 %v1607_v12, 0.0 }
 0x13f   :  { %v1271_v7 = vadd.f32 %v1270_v63, %v1240_v62  ;;  %v1241_v9 = vmax.f32 %v1177_v0, 0.0  ;;  %v3338_v10 = vpop.f32.mrf.mxu1  ;;  %v1198_v29 = vadd.f32 %v3300_v6, %v4082_v61  ;;  %v3571_v62 = vld [vmem:[%s4318_s2] ss:$0 sm:$0xff] }
 0x140   :  { %v1693_v11 = vadd.f32 %v1692_v4, %v1662_v3  ;;  %v1663_v13 = vmax.f32 %v1599_v5, 0.0  ;;  %v1189_v14 = vpop.f32.mrf.mxu0  ;;  %v1620_v35 = vadd.f32 %v3338_v10, %v4082_v61 }
 0x141   :  { %v1272_v16 = vadd.f32 %v1271_v7, %v1241_v9  ;;  %v1190_v17 = vadd.f32 %v4082_v61, %v1189_v14  ;;  %v1611_v18 = vpop.f32.mrf.mxu1  ;;  %v1246_v48 = vmax.f32 %v1198_v29, 0.0 }
 0x142   :  { %v1694_v20 = vadd.f32 %v1693_v11, %v1663_v13  ;;  %v1612_v21 = vadd.f32 %v4082_v61, %v1611_v18  ;;  %v3301_v22 = vpop.f32.mrf.mxu0  ;;  %v1668_v52 = vmax.f32 %v1620_v35, 0.0  ;;  %v4244_v18 = vld [vmem:[%s4318_s2] ss:$0 sm:$0xff] }
 0x143   :  { %v1273_v24 = vadd.f32 %v1272_v16, %v1242_v15  ;;  %v3339_v25 = vpop.f32.mrf.mxu1  ;;  %v1244_v31 = vmax.f32 %v1190_v17, 0.0  ;;  %v1201_v41 = vadd.f32 %v3301_v22, %v4082_v61 }
 0x144   :  { %v1695_v27 = vadd.f32 %v1694_v20, %v1664_v19  ;;  %v1192_v28 = vpop.f32.mrf.mxu0  ;;  %v1666_v36 = vmax.f32 %v1612_v21, 0.0  ;;  %v1623_v45 = vadd.f32 %v3339_v25, %v4082_v61 }
 0x145   :  { %v1274_v32 = vadd.f32 %v1273_v24, %v1243_v23  ;;  %v1193_v33 = vadd.f32 %v4082_v61, %v1192_v28  ;;  %v1614_v34 = vpop.f32.mrf.mxu1  ;;  %v1247_v56 = vmax.f32 %v1201_v41, 0.0 }
 0x146   :  { %v1696_v37 = vadd.f32 %v1695_v27, %v1665_v26  ;;  %v1615_v38 = vadd.f32 %v4082_v61, %v1614_v34  ;;  %v3304_v39 = vpop.f32.mrf.mxu0  ;;  %v1669_v59 = vmax.f32 %v1623_v45, 0.0 }
 0x147   :  { %v1275_v40 = vadd.f32 %v1274_v32, %v1244_v31  ;;  %v1245_v42 = vmax.f32 %v1193_v33, 0.0  ;;  %v3342_v43 = vpop.f32.mrf.mxu1  ;;  %v1214_v63 = vadd.f32 %v3571_v62, %v3304_v39 }
 0x148   :  { %v1697_v44 = vadd.f32 %v1696_v37, %v1666_v36  ;;  %v1667_v46 = vmax.f32 %v1615_v38, 0.0  ;;  %v1205_v47 = vpop.f32.mrf.mxu0  ;;  %v1636_v4 = vadd.f32 %v3571_v62, %v3342_v43 }
 0x149   :  { %v1276_v49 = vadd.f32 %v1275_v40, %v1245_v42  ;;  %v1206_v50 = vadd.f32 %v4082_v61, %v1205_v47  ;;  %v1627_v51 = vpop.f32.mrf.mxu1  ;;  %v1250_v16 = vmax.f32 %v1214_v63, 0.0 }
 0x14a   :  { %v1698_v53 = vadd.f32 %v1697_v44, %v1667_v46  ;;  %v1628_v54 = vadd.f32 %v4082_v61, %v1627_v51  ;;  %v3305_v55 = vpop.f32.mrf.mxu0  ;;  %v1672_v20 = vmax.f32 %v1636_v4, 0.0 }
 0x14b   :  { %v1277_v57 = vadd.f32 %v1276_v49, %v1246_v48  ;;  %v3343_v58 = vpop.f32.mrf.mxu1  ;;  %v1248_v0 = vmax.f32 %v1206_v50, 0.0  ;;  %v1217_v9 = vadd.f32 %v3571_v62, %v3305_v55 }
 0x14c   :  { %v1699_v60 = vadd.f32 %v1698_v53, %v1668_v52  ;;  %v1208_v30 = vpop.f32.mrf.mxu0  ;;  %v1670_v5 = vmax.f32 %v1628_v54, 0.0  ;;  %v1639_v13 = vadd.f32 %v3571_v62, %v3343_v58 }
 0x14d   :  { %v1278_v1 = vadd.f32 %v1277_v57, %v1247_v56  ;;  %v1209_v2 = vadd.f32 %v3571_v62, %v1208_v30  ;;  %v1630_v3 = vpop.f32.mrf.mxu1  ;;  %v1251_v24 = vmax.f32 %v1217_v9, 0.0 }
 0x14e   :  { %v1700_v6 = vadd.f32 %v1699_v60, %v1669_v59  ;;  %v1631_v61 = vadd.f32 %v3571_v62, %v1630_v3  ;;  %v3352_v7 = vpop.f32.mrf.mxu0  ;;  %v1673_v27 = vmax.f32 %v1639_v13, 0.0 }
 0x14f   :  { %v1279_v8 = vadd.f32 %v1278_v1, %v1248_v0  ;;  %v1249_v10 = vmax.f32 %v1209_v2, 0.0  ;;  %v3390_v11 = vpop.f32.mrf.mxu1  ;;  %v1946_v33 = vadd.f32 %v3352_v7, %v4244_v18 }
 0x150   :  { %v1701_v12 = vadd.f32 %v1700_v6, %v1670_v5  ;;  %v1671_v14 = vmax.f32 %v1631_v61, 0.0  ;;  %v1937_v15 = vpop.f32.mrf.mxu0  ;;  %v2368_v37 = vadd.f32 %v3390_v11, %v4244_v18 }
 0x151   :  { %v1280_v17 = vadd.f32 %v1279_v8, %v1249_v10  ;;  %v2359_v19 = vpop.f32.mrf.mxu1  ;;  %v1938_v22 = vadd.f32 %v4244_v18, %v1937_v15  ;;  %v2066_v51 = vmax.f32 %v1946_v33, 0.0 }
 0x152   :  { %v1702_v21 = vadd.f32 %v1701_v12, %v1671_v14  ;;  %v3353_v23 = vpop.f32.mrf.mxu0  ;;  %v2360_v29 = vadd.f32 %v4244_v18, %v2359_v19  ;;  %v2488_v56 = vmax.f32 %v2368_v37, 0.0 }
 0x153   :  { %v1281_v25 = vadd.f32 %v1280_v17, %v1250_v16  ;;  %v3391_v26 = vpop.f32.mrf.mxu1  ;;  %v2064_v38 = vmax.f32 %v1938_v22, 0.0  ;;  %v1949_v42 = vadd.f32 %v3353_v23, %v4244_v18 }
 0x154   :  { %v1703_v28 = vadd.f32 %v1702_v21, %v1672_v20  ;;  %v1940_v31 = vpop.f32.mrf.mxu0  ;;  %v2371_v43 = vadd.f32 %v3391_v26, %v4244_v18  ;;  %v2486_v47 = vmax.f32 %v2360_v29, 0.0 }
 0x155   :  { %v1282_v32 = vadd.f32 %v1281_v25, %v1251_v24  ;;  %v1941_v34 = vadd.f32 %v4244_v18, %v1940_v31  ;;  %v2362_v35 = vpop.f32.mrf.mxu1  ;;  %v2067_v30 = vmax.f32 %v1949_v42, 0.0 }
 0x156   :  { %v1704_v36 = vadd.f32 %v1703_v28, %v1673_v27  ;;  %v2363_v39 = vadd.f32 %v4244_v18, %v2362_v35  ;;  %v3356_v40 = vpop.f32.mrf.mxu0  ;;  %v2489_v62 = vmax.f32 %v2371_v43, 0.0 }
 0x157   :  { %v1283_v41 = vrot.slane %v1282_v32, 4  ;;  %v2065_v44 = vmax.f32 %v1941_v34, 0.0  ;;  %v3394_v45 = vpop.f32.mrf.mxu1  ;;  %v1962_v3 = vadd.f32 %v3356_v40, %v4244_v18 }
 0x158   :  { %v1705_v46 = vrot.slane %v1704_v36, 4  ;;  %v2487_v48 = vmax.f32 %v2363_v39, 0.0  ;;  %v1953_v49 = vpop.f32.mrf.mxu0  ;;  %v2384_v4 = vadd.f32 %v3394_v45, %v4244_v18 }
 0x159   :  { %v1284_v50 = vadd.f32 %v1283_v41, %v1282_v32  ;;  %v2096_v52 = vadd.f32 %v2065_v44, %v2064_v38  ;;  %v1954_v53 = vadd.f32 %v4244_v18, %v1953_v49  ;;  %v2375_v54 = vpop.f32.mrf.mxu1  ;;  %v2070_v27 = vmax.f32 %v1962_v3, 0.0 }
 0x15a   :  { %v1706_v55 = vadd.f32 %v1705_v46, %v1704_v36  ;;  %v2518_v57 = vadd.f32 %v2487_v48, %v2486_v47  ;;  %v2376_v58 = vadd.f32 %v4244_v18, %v2375_v54  ;;  %v3357_v59 = vpop.f32.mrf.mxu0  ;;  %v2492_v33 = vmax.f32 %v2384_v4, 0.0 }
 0x15b   :  { %v1285_v60 = vrot.slane %v1284_v50, 2  ;;  %v2097_v63 = vadd.f32 %v2096_v52, %v2066_v51  ;;  %v3395_v0 = vpop.f32.mrf.mxu1  ;;  %v2068_v61 = vmax.f32 %v1954_v53, 0.0  ;;  %v1965_v17 = vadd.f32 %v3357_v59, %v4244_v18 }
 0x15c   :  { %v1707_v1 = vrot.slane %v1706_v55, 2  ;;  %v2519_v2 = vadd.f32 %v2518_v57, %v2488_v56  ;;  %v1956_v5 = vpop.f32.mrf.mxu0  ;;  %v2490_v11 = vmax.f32 %v2376_v58, 0.0  ;;  %v2387_v23 = vadd.f32 %v3395_v0, %v4244_v18 }
 0x15d   :  { %v1286_v6 = vadd.f32 %v1285_v60, %v1284_v50  ;;  %v2098_v7 = vadd.f32 %v2097_v63, %v2067_v30  ;;  %v1957_v8 = vadd.f32 %v4244_v18, %v1956_v5  ;;  %v2378_v9 = vpop.f32.mrf.mxu1  ;;  %v2071_v37 = vmax.f32 %v1965_v17, 0.0 }
 0x15e   :  { %v1708_v10 = vadd.f32 %v1707_v1, %v1706_v55  ;;  %v2520_v12 = vadd.f32 %v2519_v2, %v2489_v62  ;;  %v2379_v13 = vadd.f32 %v4244_v18, %v2378_v9  ;;  %v3360_v14 = vpop.f32.mrf.mxu0  ;;  %v2493_v40 = vmax.f32 %v2387_v23, 0.0 }
 0x15f   :  { %v1287_v15 = vrot.slane %v1286_v6, 1  ;;  %v2099_v16 = vadd.f32 %v2098_v7, %v2068_v61  ;;  %v2069_v19 = vmax.f32 %v1957_v8, 0.0  ;;  %v3398_v20 = vpop.f32.mrf.mxu1  ;;  %v1978_v43 = vadd.f32 %v3360_v14, %v4244_v18 }
 0x160   :  { %v1709_v21 = vrot.slane %v1708_v10, 1  ;;  %v2521_v22 = vadd.f32 %v2520_v12, %v2490_v11  ;;  %v2491_v24 = vmax.f32 %v2379_v13, 0.0  ;;  %v1969_v25 = vpop.f32.mrf.mxu0  ;;  %v2400_v48 = vadd.f32 %v3398_v20, %v4244_v18 }
 0x161   :  { %v1288_v26 = vadd.f32 %v1287_v15, %v1286_v6  ;;  %v2100_v28 = vadd.f32 %v2099_v16, %v2069_v19  ;;  %v1970_v29 = vadd.f32 %v4244_v18, %v1969_v25  ;;  %v2391_v31 = vpop.f32.mrf.mxu1  ;;  %v2074_v30 = vmax.f32 %v1978_v43, 0.0 }
 0x162   :  { %v1710_v32 = vadd.f32 %v1709_v21, %v1708_v10  ;;  %v2522_v34 = vadd.f32 %v2521_v22, %v2491_v24  ;;  %v2392_v35 = vadd.f32 %v4244_v18, %v2391_v31  ;;  %v3361_v36 = vpop.f32.mrf.mxu0  ;;  %v2496_v1 = vmax.f32 %v2400_v48, 0.0 }
 0x163   :  { %1289 = vst [vmem:[#allocation2 + $0x2] sm:$0x1] %v1288_v26  ;;  %v2101_v38 = vadd.f32 %v2100_v28, %v2070_v27  ;;  %v3399_v39 = vpop.f32.mrf.mxu1  ;;  %v2072_v44 = vmax.f32 %v1970_v29, 0.0  ;;  %v1981_v54 = vadd.f32 %v3361_v36, %v4244_v18 }
 0x164   :  { %1711 = vst [vmem:[#allocation2 + $0x3] sm:$0x1] %v1710_v32  ;;  %v2523_v41 = vadd.f32 %v2522_v34, %v2492_v33  ;;  %v1972_v42 = vpop.f32.mrf.mxu0  ;;  %v2494_v49 = vmax.f32 %v2392_v35, 0.0  ;;  %v2403_v58 = vadd.f32 %v3399_v39, %v4244_v18 }
 0x165   :  { %v2102_v45 = vadd.f32 %v2101_v38, %v2071_v37  ;;  %v1973_v46 = vadd.f32 %v4244_v18, %v1972_v42  ;;  %v2394_v47 = vpop.f32.mrf.mxu1  ;;  %v2075_v5 = vmax.f32 %v1981_v54, 0.0 }
 0x166   :  { %v2524_v50 = vadd.f32 %v2523_v41, %v2493_v40  ;;  %v2395_v51 = vadd.f32 %v4244_v18, %v2394_v47  ;;  %v3364_v52 = vpop.f32.mrf.mxu0  ;;  %v2497_v7 = vmax.f32 %v2403_v58, 0.0 }
 0x167   :  { %v2103_v53 = vadd.f32 %v2102_v45, %v2072_v44  ;;  %v2073_v55 = vmax.f32 %v1973_v46, 0.0  ;;  %v3402_v56 = vpop.f32.mrf.mxu1  ;;  %v1994_v10 = vadd.f32 %v3364_v52, %v4244_v18 }
 0x168   :  { %v2525_v57 = vadd.f32 %v2524_v50, %v2494_v49  ;;  %v2495_v59 = vmax.f32 %v2395_v51, 0.0  ;;  %v1985_v60 = vpop.f32.mrf.mxu0  ;;  %v2416_v15 = vadd.f32 %v3402_v56, %v4244_v18 }
 0x169   :  { %v2104_v62 = vadd.f32 %v2103_v53, %v2073_v55  ;;  %v1986_v63 = vadd.f32 %v4244_v18, %v1985_v60  ;;  %v2407_v0 = vpop.f32.mrf.mxu1  ;;  %v2078_v29 = vmax.f32 %v1994_v10, 0.0 }
 0x16a   :  { %v2526_v2 = vadd.f32 %v2525_v57, %v2495_v59  ;;  %v2408_v3 = vadd.f32 %v4244_v18, %v2407_v0  ;;  %v3365_v4 = vpop.f32.mrf.mxu0  ;;  %v2500_v34 = vmax.f32 %v2416_v15, 0.0 }
 0x16b   :  { %v2105_v6 = vadd.f32 %v2104_v62, %v2074_v30  ;;  %v3403_v61 = vpop.f32.mrf.mxu1  ;;  %v2076_v11 = vmax.f32 %v1986_v63, 0.0  ;;  %v1997_v22 = vadd.f32 %v3365_v4, %v4244_v18 }
 0x16c   :  { %v2527_v8 = vadd.f32 %v2526_v2, %v2496_v1  ;;  %v1988_v9 = vpop.f32.mrf.mxu0  ;;  %v2498_v16 = vmax.f32 %v2408_v3, 0.0  ;;  %v2419_v26 = vadd.f32 %v3403_v61, %v4244_v18 }
 0x16d   :  { %v2106_v12 = vadd.f32 %v2105_v6, %v2075_v5  ;;  %v1989_v13 = vadd.f32 %v4244_v18, %v1988_v9  ;;  %v2410_v14 = vpop.f32.mrf.mxu1  ;;  %v2079_v38 = vmax.f32 %v1997_v22, 0.0 }
 0x16e   :  { %v2528_v17 = vadd.f32 %v2527_v8, %v2497_v7  ;;  %v2411_v19 = vadd.f32 %v4244_v18, %v2410_v14  ;;  %v3368_v20 = vpop.f32.mrf.mxu0  ;;  %v2501_v41 = vmax.f32 %v2419_v26, 0.0 }
 0x16f   :  { %v2107_v21 = vadd.f32 %v2106_v12, %v2076_v11  ;;  %v2077_v23 = vmax.f32 %v1989_v13, 0.0  ;;  %v3406_v24 = vpop.f32.mrf.mxu1  ;;  %v2010_v44 = vadd.f32 %v3368_v20, %v4244_v18 }
 0x170   :  { %v2529_v25 = vadd.f32 %v2528_v17, %v2498_v16  ;;  %v2499_v27 = vmax.f32 %v2411_v19, 0.0  ;;  %v2001_v28 = vpop.f32.mrf.mxu0  ;;  %v2432_v49 = vadd.f32 %v3406_v24, %v4244_v18 }
 0x171   :  { %v2108_v31 = vadd.f32 %v2107_v21, %v2077_v23  ;;  %v2002_v32 = vadd.f32 %v4244_v18, %v2001_v28  ;;  %v2423_v33 = vpop.f32.mrf.mxu1  ;;  %v2082_v62 = vmax.f32 %v2010_v44, 0.0 }
 0x172   :  { %v2530_v35 = vadd.f32 %v2529_v25, %v2499_v27  ;;  %v2424_v36 = vadd.f32 %v4244_v18, %v2423_v33  ;;  %v3369_v37 = vpop.f32.mrf.mxu0  ;;  %v2504_v2 = vmax.f32 %v2432_v49, 0.0 }
 0x173   :  { %v2109_v39 = vadd.f32 %v2108_v31, %v2078_v29  ;;  %v3407_v40 = vpop.f32.mrf.mxu1  ;;  %v2080_v45 = vmax.f32 %v2002_v32, 0.0  ;;  %v2013_v55 = vadd.f32 %v3369_v37, %v4244_v18 }
 0x174   :  { %v2531_v42 = vadd.f32 %v2530_v35, %v2500_v34  ;;  %v2004_v43 = vpop.f32.mrf.mxu0  ;;  %v2502_v50 = vmax.f32 %v2424_v36, 0.0  ;;  %v2435_v59 = vadd.f32 %v3407_v40, %v4244_v18 }
 0x175   :  { %v2110_v46 = vadd.f32 %v2109_v39, %v2079_v38  ;;  %v2005_v47 = vadd.f32 %v4244_v18, %v2004_v43  ;;  %v2426_v48 = vpop.f32.mrf.mxu1  ;;  %v2083_v6 = vmax.f32 %v2013_v55, 0.0 }
 0x176   :  { %v2532_v51 = vadd.f32 %v2531_v42, %v2501_v41  ;;  %v2427_v52 = vadd.f32 %v4244_v18, %v2426_v48  ;;  %v3372_v53 = vpop.f32.mrf.mxu0  ;;  %v2505_v8 = vmax.f32 %v2435_v59, 0.0 }
 0x177   :  { %v2111_v54 = vadd.f32 %v2110_v46, %v2080_v45  ;;  %v2081_v56 = vmax.f32 %v2005_v47, 0.0  ;;  %v3410_v57 = vpop.f32.mrf.mxu1  ;;  %v2026_v11 = vadd.f32 %v3372_v53, %v4244_v18 }
 0x178   :  { %v2533_v58 = vadd.f32 %v2532_v51, %v2502_v50  ;;  %v2503_v60 = vmax.f32 %v2427_v52, 0.0  ;;  %v2017_v30 = vpop.f32.mrf.mxu0  ;;  %v2448_v16 = vadd.f32 %v3410_v57, %v4244_v18 }
 0x179   :  { %v2112_v63 = vadd.f32 %v2111_v54, %v2081_v56  ;;  %v2018_v0 = vadd.f32 %v4244_v18, %v2017_v30  ;;  %v2439_v1 = vpop.f32.mrf.mxu1  ;;  %v2086_v31 = vmax.f32 %v2026_v11, 0.0 }
 0x17a   :  { %v2534_v3 = vadd.f32 %v2533_v58, %v2503_v60  ;;  %v2440_v4 = vadd.f32 %v4244_v18, %v2439_v1  ;;  %v3373_v5 = vpop.f32.mrf.mxu0  ;;  %v2508_v35 = vmax.f32 %v2448_v16, 0.0 }
 0x17b   :  { %v2113_v61 = vadd.f32 %v2112_v63, %v2082_v62  ;;  %v3411_v7 = vpop.f32.mrf.mxu1  ;;  %v2084_v12 = vmax.f32 %v2018_v0, 0.0  ;;  %v2029_v23 = vadd.f32 %v3373_v5, %v4244_v18 }
 0x17c   :  { %v2535_v9 = vadd.f32 %v2534_v3, %v2504_v2  ;;  %v2020_v10 = vpop.f32.mrf.mxu0  ;;  %v2506_v17 = vmax.f32 %v2440_v4, 0.0  ;;  %v2451_v27 = vadd.f32 %v3411_v7, %v4244_v18 }
 0x17d   :  { %v2114_v13 = vadd.f32 %v2113_v61, %v2083_v6  ;;  %v2021_v14 = vadd.f32 %v4244_v18, %v2020_v10  ;;  %v2442_v15 = vpop.f32.mrf.mxu1  ;;  %v2087_v39 = vmax.f32 %v2029_v23, 0.0 }
 0x17e   :  { %v2536_v19 = vadd.f32 %v2535_v9, %v2505_v8  ;;  %v2443_v20 = vadd.f32 %v4244_v18, %v2442_v15  ;;  %v3376_v21 = vpop.f32.mrf.mxu0  ;;  %v2509_v42 = vmax.f32 %v2451_v27, 0.0 }
 0x17f   :  { %v2115_v22 = vadd.f32 %v2114_v13, %v2084_v12  ;;  %v2085_v24 = vmax.f32 %v2021_v14, 0.0  ;;  %v3414_v25 = vpop.f32.mrf.mxu1  ;;  %v2042_v45 = vadd.f32 %v3376_v21, %v4244_v18 }
 0x180   :  { %v2537_v26 = vadd.f32 %v2536_v19, %v2506_v17  ;;  %v2507_v28 = vmax.f32 %v2443_v20, 0.0  ;;  %v2033_v29 = vpop.f32.mrf.mxu0  ;;  %v2464_v50 = vadd.f32 %v3414_v25, %v4244_v18 }
 0x181   :  { %v2116_v32 = vadd.f32 %v2115_v22, %v2085_v24  ;;  %v2034_v33 = vadd.f32 %v4244_v18, %v2033_v29  ;;  %v2455_v34 = vpop.f32.mrf.mxu1  ;;  %v2090_v63 = vmax.f32 %v2042_v45, 0.0 }
 0x182   :  { %v2538_v36 = vadd.f32 %v2537_v26, %v2507_v28  ;;  %v2456_v37 = vadd.f32 %v4244_v18, %v2455_v34  ;;  %v3377_v38 = vpop.f32.mrf.mxu0  ;;  %v2512_v3 = vmax.f32 %v2464_v50, 0.0 }
 0x183   :  { %v2117_v40 = vadd.f32 %v2116_v32, %v2086_v31  ;;  %v3415_v41 = vpop.f32.mrf.mxu1  ;;  %v2088_v46 = vmax.f32 %v2034_v33, 0.0  ;;  %v2045_v56 = vadd.f32 %v3377_v38, %v4244_v18 }
 0x184   :  { %v2539_v43 = vadd.f32 %v2538_v36, %v2508_v35  ;;  %v2036_v44 = vpop.f32.mrf.mxu0  ;;  %v2510_v51 = vmax.f32 %v2456_v37, 0.0  ;;  %v2467_v60 = vadd.f32 %v3415_v41, %v4244_v18 }
 0x185   :  { %v2118_v47 = vadd.f32 %v2117_v40, %v2087_v39  ;;  %v2037_v48 = vadd.f32 %v4244_v18, %v2036_v44  ;;  %v2458_v49 = vpop.f32.mrf.mxu1  ;;  %v2091_v61 = vmax.f32 %v2045_v56, 0.0 }
 0x186   :  { %v2540_v52 = vadd.f32 %v2539_v43, %v2509_v42  ;;  %v2459_v53 = vadd.f32 %v4244_v18, %v2458_v49  ;;  %v3380_v54 = vpop.f32.mrf.mxu0  ;;  %v2513_v9 = vmax.f32 %v2467_v60, 0.0 }
 0x187   :  { %v2119_v55 = vadd.f32 %v2118_v47, %v2088_v46  ;;  %v2089_v57 = vmax.f32 %v2037_v48, 0.0  ;;  %v3418_v58 = vpop.f32.mrf.mxu1  ;;  %v2058_v12 = vadd.f32 %v3380_v54, %v4244_v18 }
 0x188   :  { %v2541_v59 = vadd.f32 %v2540_v52, %v2510_v51  ;;  %v2511_v30 = vmax.f32 %v2459_v53, 0.0  ;;  %v2049_v62 = vpop.f32.mrf.mxu0  ;;  %v2480_v17 = vadd.f32 %v3418_v58, %v4244_v18  ;;  %v3060_v52 = vld [vmem:[%s4320_s4] ss:$0 sm:$0xff] }
 0x189   :  { %v2120_v0 = vadd.f32 %v2119_v55, %v2089_v57  ;;  %v2050_v1 = vadd.f32 %v4244_v18, %v2049_v62  ;;  %v2471_v2 = vpop.f32.mrf.mxu1  ;;  %v2094_v28 = vmax.f32 %v2058_v12, 0.0 }
 0x18a   :  { %v2542_v4 = vadd.f32 %v2541_v59, %v2511_v30  ;;  %v2472_v5 = vadd.f32 %v4244_v18, %v2471_v2  ;;  %v3381_v6 = vpop.f32.mrf.mxu0  ;;  %v2516_v31 = vmax.f32 %v2480_v17, 0.0 }
 0x18b   :  { %v2121_v7 = vadd.f32 %v2120_v0, %v2090_v63  ;;  %v3419_v8 = vpop.f32.mrf.mxu1  ;;  %v2092_v13 = vmax.f32 %v2050_v1, 0.0  ;;  %v2061_v23 = vadd.f32 %v3381_v6, %v4244_v18 }
 0x18c   :  { %v2543_v10 = vadd.f32 %v2542_v4, %v2512_v3  ;;  %v2052_v11 = vpop.f32.mrf.mxu0  ;;  %v2514_v19 = vmax.f32 %v2472_v5, 0.0  ;;  %v2483_v26 = vadd.f32 %v3419_v8, %v4244_v18 }
 0x18d   :  { %v2122_v14 = vadd.f32 %v2121_v7, %v2091_v61  ;;  %v2053_v15 = vadd.f32 %v4244_v18, %v2052_v11  ;;  %v2474_v16 = vpop.f32.mrf.mxu1  ;;  %v2095_v33 = vmax.f32 %v2061_v23, 0.0 }
 0x18e   :  { %v2544_v20 = vadd.f32 %v2543_v10, %v2513_v9  ;;  %v2475_v21 = vadd.f32 %v4244_v18, %v2474_v16  ;;  %v2517_v35 = vmax.f32 %v2483_v26, 0.0 }
 0x18f   :  { %v2123_v22 = vadd.f32 %v2122_v14, %v2092_v13  ;;  %v2093_v24 = vmax.f32 %v2053_v15, 0.0 }
 0x190   :  { %v2545_v25 = vadd.f32 %v2544_v20, %v2514_v19  ;;  %v2515_v27 = vmax.f32 %v2475_v21, 0.0 }
 0x191   :  { %v2124_v29 = vadd.f32 %v2123_v22, %v2093_v24 }
 0x192   :  { %v2546_v32 = vadd.f32 %v2545_v25, %v2515_v27 }
 0x193   :  { %v2125_v34 = vadd.f32 %v2124_v29, %v2094_v28 }
 0x194   :  { %v2547_v36 = vadd.f32 %v2546_v32, %v2516_v31 }
 0x195   :  { %v2126_v37 = vadd.f32 %v2125_v34, %v2095_v33 }
 0x196   :  { %v2548_v38 = vadd.f32 %v2547_v36, %v2517_v35 }
 0x197   :  { %v2127_v39 = vrot.slane %v2126_v37, 4 }
 0x198   :  { %v2549_v40 = vrot.slane %v2548_v38, 4 }
 0x199   :  { %v2128_v41 = vadd.f32 %v2127_v39, %v2126_v37 }
 0x19a   :  { %v2550_v42 = vadd.f32 %v2549_v40, %v2548_v38 }
 0x19b   :  { %v2129_v43 = vrot.slane %v2128_v41, 2 }
 0x19c   :  { %v2551_v44 = vrot.slane %v2550_v42, 2 }
 0x19d   :  { %v2130_v45 = vadd.f32 %v2129_v43, %v2128_v41 }
 0x19e   :  { %v2552_v46 = vadd.f32 %v2551_v44, %v2550_v42 }
 0x19f   :  { %v2131_v18 = vrot.slane %v2130_v45, 1 }
 0x1a0   :  { %v2553_v47 = vrot.slane %v2552_v46, 1 }
 0x1a1   :  { %v2132_v48 = vadd.f32 %v2131_v18, %v2130_v45 }
 0x1a2   :  { %v2554_v49 = vadd.f32 %v2553_v47, %v2552_v46 }
 0x1a3   :  { %2133 = vst [vmem:[#allocation2 + $0x4] sm:$0x1] %v2132_v48 }
 0x1a4   :  { %2555 = vst [vmem:[#allocation2 + $0x5] sm:$0x1] %v2554_v49 }
 0x1ab   :  { %v2556_v50 = vld [vmem:[#allocation2] sm:$0xff] }
 0x1ac   :  { %v2557_v51 = vpack.c.bf16 %v2556_v50, %v2556_v50 }
 0x1ae   :  { %3437 = vmatmul.mubr.bf16.vlgmr.msra.gmra.mxu0 %v2557_v51 }
 0x26e   :  { %v2663_v53 = vpop.f32.mrf.mxu0 }
 0x26f   :  { %v2664_v54 = vadd.f32 %v3060_v52, %v2663_v53 }
 0x270   :  { %v3438_v55 = vpop.f32.mrf.mxu0 }
 0x271   :  { %2669 = vst [vmem:[#allocation3] sm:$0xff] %v2664_v54 }
 0x272   :  { %v2666_v56 = vpop.f32.mrf.mxu0 }
 0x273   :  { %3583 = shalt.err (!%p3580_p4)
}
 0x274   :  { %2679 = dma.vmem_to_hbm [thread:$0]  %s2677_s1, 128, %s4321_s5, [#allocation4]   ;;  %v3439_v57 = vpop.f32.mrf.mxu0 }
 0x275   :  { %3592 = dma.done.wait [#allocation4], 128  }
 0x276   :  { %3593 = vsyncadd [#allocation4], 4294967168 }
 0x277   :  { %2683 = vsyncpa [#allocation4], 1 }

</bundles_post_ra>
